<compile_context>
chip_gen: v6e
topology: v6e:2x2x1
jax: 0.10.0
libtpu: 0.0.40
codegen_flags: <defaults>
</compile_context>

<pallas_src>
import functools

import jax
import jax.numpy as jnp
from jax.experimental import pallas as pl
from jax.experimental.pallas import tpu as pltpu


def rnn_fc_kernel(x_ref,     # (Bb, T, I)  batch-block of the input
                  wih0_ref,  # (I, H)      W_ih0^T
                  whh0_ref,  # (H, H)      W_hh0^T
                  b0_ref,    # (1, H)      b_ih0 + b_hh0   (f32)
                  w1_ref,    # (2H, H)     [W_ih1^T ; W_hh1^T]
                  b1_ref,    # (1, H)      b_ih1 + b_hh1   (f32)
                  wfc_ref,   # (T*H, Cp)   W_fc^T, class dim padded to 128
                  bfc_ref,   # (1, Cp)     b_fc padded      (f32)
                  out_ref,   # (Bb, Cp)
                  hseq_ref,  # (Bb, T*H)   VMEM scratch slab for the FC input
                  *, split_layer1):
    Bb, T, I = x_ref.shape
    H = whh0_ref.shape[1]
    cdt = whh0_ref.dtype            # MXU operand dtype (bf16 default, f32 optional)
    f32 = jnp.float32

    # ---- hoisted layer-0 input projection: ONE MXU matmul (M = Bb*T) -------
    # Independent of the recurrence -> fully overlappable with the first steps.
    x2 = x_ref[...].reshape(Bb * T, I)                        # leading-dim merge
    xp = jnp.dot(x2.astype(cdt), wih0_ref[...], preferred_element_type=f32)
    xp = (xp + b0_ref[...].astype(f32)).reshape(Bb, T, H)     # (Bb, T, H), f32

    # Hoist the per-step bias broadcast out of the unrolled loop
    # (JAX does not CSE broadcast_in_dim).
    b1 = jnp.broadcast_to(b1_ref[...].astype(f32), (Bb, H))

    h0 = jnp.zeros((Bb, H), f32)
    h1 = jnp.zeros((Bb, H), f32)
    # Fully unrolled static time loop: only the two carried states live in vregs;
    # the scheduler overlaps MXU pushes / EUP tanh / xp slices across steps.
    for t in range(T):
        # Layer 0: the serial chain is a single K = H matmul + tanh.
        h0 = jnp.tanh(xp[:, t, :] +
                      jnp.dot(h0.astype(cdt), whh0_ref[...],
                              preferred_element_type=f32))
        if split_layer1:
            # v7x: two matmuls accumulating (MRB adds in place); no lane concat.
            pre1 = (jnp.dot(h0.astype(cdt), w1_ref[:H, :],
                            preferred_element_type=f32) +
                    jnp.dot(h1.astype(cdt), w1_ref[H:, :],
                            preferred_element_type=f32))
        else:
            # v5e/v6e (MRF FIFO): one fused matmul over the concatenated [h0, h1].
            in1 = jnp.concatenate([h0, h1], axis=-1).astype(cdt)     # (Bb, 2H)
            pre1 = jnp.dot(in1, w1_ref[...], preferred_element_type=f32)
        h1 = jnp.tanh(pre1 + b1)
        # Stash h1 into the scratch slab (uses the otherwise idle vst slot and
        # bounds vreg pressure; the FC input never round-trips to HBM).
        hseq_ref[:, t * H:(t + 1) * H] = h1.astype(hseq_ref.dtype)

    # ---- FC off the recurrence critical path: one K = T*H matmul -----------
    logits = (jnp.dot(hseq_ref[...], wfc_ref[...], preferred_element_type=f32)
              + bfc_ref[...].astype(f32))
    out_ref[...] = logits.astype(out_ref.dtype)


def _round_up(n, m):
    return ((n + m - 1) // m) * m


def rnn_forward(x, params, *, matmul_dtype=jnp.bfloat16, batch_block=128,
                split_layer1_matmuls=False):
    """x: (B, T, I) float32, batch_first like the torch module. Returns (B, C)."""
    B, T, I = x.shape
    H = params['w_hh0'].shape[0]
    C = params['w_fc'].shape[0]
    C_pad = _round_up(C, 128)        # lane-dense FC N dim / unmasked output store

    # ---- parameter glue (pure layout, no compute) ---------------------------
    # bf16 MXU operands are native on v5e, v6e and v7x; accumulation stays f32.
    wih0 = params['w_ih0'].T.astype(matmul_dtype)                         # (I, H)
    whh0 = params['w_hh0'].T.astype(matmul_dtype)                         # (H, H)
    b0 = (params['b_ih0'] + params['b_hh0'])[None, :].astype(jnp.float32)  # (1, H)
    w1 = jnp.concatenate([params['w_ih1'].T, params['w_hh1'].T],
                         axis=0).astype(matmul_dtype)                     # (2H, H)
    b1 = (params['b_ih1'] + params['b_hh1'])[None, :].astype(jnp.float32)  # (1, H)
    wfc = jnp.zeros((T * H, C_pad), matmul_dtype).at[:, :C].set(
        params['w_fc'].T.astype(matmul_dtype))                            # (T*H, Cp)
    bfc = jnp.zeros((1, C_pad), jnp.float32).at[0, :C].set(
        params['b_fc'].astype(jnp.float32))                               # (1, Cp)

    # ---- batch blocking ------------------------------------------------------
    # Big blocks fill MXU rows and amortize the ~0.35 us/grid-step overhead;
    # for moderate batches split into >=2 blocks so dual-TC chips (v7x) shard.
    batch_block = max(8, _round_up(batch_block, 8))
    Bb = min(batch_block, _round_up(B, 8))
    if B <= Bb and B > 8:
        Bb = _round_up((B + 1) // 2, 8)
    B_pad = _round_up(B, Bb)
    if B_pad != B:
        x = jnp.pad(x, ((0, B_pad - B), (0, 0), (0, 0)))
    grid = (B_pad // Bb,)

    kernel = functools.partial(rnn_fc_kernel, split_layer1=split_layer1_matmuls)
    out = pl.pallas_call(
        kernel,
        out_shape=jax.ShapeDtypeStruct((B_pad, C_pad), x.dtype),
        grid=grid,
        in_specs=[
            pl.BlockSpec((Bb, T, I), lambda b: (b, 0, 0)),   # no HBM transpose of x
            pl.BlockSpec((I, H), lambda b: (0, 0)),
            pl.BlockSpec((H, H), lambda b: (0, 0)),
            pl.BlockSpec((1, H), lambda b: (0, 0)),
            pl.BlockSpec((2 * H, H), lambda b: (0, 0)),
            pl.BlockSpec((1, H), lambda b: (0, 0)),
            pl.BlockSpec((T * H, C_pad), lambda b: (0, 0)),
            pl.BlockSpec((1, C_pad), lambda b: (0, 0)),
        ],
        out_specs=pl.BlockSpec((Bb, C_pad), lambda b: (b, 0)),
        scratch_shapes=[pltpu.VMEM((Bb, T * H), matmul_dtype)],
        compiler_params=pltpu.CompilerParams(
            dimension_semantics=("parallel",)),
    )(x, wih0, whh0, b0, w1, b1, wfc, bfc)
    return out[:B, :C]


def rnn_reference(x, params):
    """Pure-JAX reference matching PyTorch nn.RNN(batch_first=True) + Linear."""
    B, T, I = x.shape
    H = params['w_hh0'].shape[0]
    h0 = jnp.zeros((B, H), jnp.float32)
    h1 = jnp.zeros((B, H), jnp.float32)
    outs = []
    for t in range(T):
        xt = x[:, t, :]
        h0 = jnp.tanh(xt @ params['w_ih0'].T + params['b_ih0']
                      + h0 @ params['w_hh0'].T + params['b_hh0'])
        h1 = jnp.tanh(h0 @ params['w_ih1'].T + params['b_ih1']
                      + h1 @ params['w_hh1'].T + params['b_hh1'])
        outs.append(h1)
    flat = jnp.stack(outs, axis=1).reshape(B, T * H)
    return flat @ params['w_fc'].T + params['b_fc']


if __name__ == "__main__":
    # Small shapes consistent with the module structure:
    # batch=2, seq=8, input=8, hidden=32, classes=10, layers=2.
    B, T, I, H, C = 2, 8, 8, 32, 10

    key = jax.random.PRNGKey(0)
    keys = jax.random.split(key, 11)
    bound = 1.0 / jnp.sqrt(jnp.float32(H))

    def u(k, shape):
        return jax.random.uniform(k, shape, jnp.float32, -bound, bound)

    params = {
        'w_ih0': u(keys[0], (H, I)),
        'w_hh0': u(keys[1], (H, H)),
        'b_ih0': u(keys[2], (H,)),
        'b_hh0': u(keys[3], (H,)),
        'w_ih1': u(keys[4], (H, H)),
        'w_hh1': u(keys[5], (H, H)),
        'b_ih1': u(keys[6], (H,)),
        'b_hh1': u(keys[7], (H,)),
        'w_fc':  u(keys[8], (C, T * H)),
        'b_fc':  u(keys[9], (C,)),
    }
    x = jax.random.normal(keys[10], (B, T, I), jnp.float32)

    ref = rnn_reference(x, params)

    # f32 MXU operands: tight self-check (concat-fused layer 1, v5e/v6e path).
    out_f32 = rnn_forward(x, params, matmul_dtype=jnp.float32)
    jax.block_until_ready(out_f32)
    assert out_f32.shape == (B, C)
    assert jnp.allclose(out_f32, ref, atol=1e-4, rtol=1e-4), "f32 kernel mismatch"

    # f32, split layer-1 matmuls (v7x-preferred path) — same math, tight check.
    out_split = rnn_forward(x, params, matmul_dtype=jnp.float32,
                            split_layer1_matmuls=True)
    jax.block_until_ready(out_split)
    assert jnp.allclose(out_split, ref, atol=1e-4, rtol=1e-4), "split kernel mismatch"

    # default bf16 MXU operands: looser check (rounding compounds over T steps).
    out_bf16 = rnn_forward(x, params)
    jax.block_until_ready(out_bf16)
    assert out_bf16.shape == (B, C)
    assert jnp.allclose(out_bf16, ref, atol=1e-1, rtol=1e-1), "bf16 kernel mismatch"

    print("KERNEL_OK")
</pallas_src>

<mosaic_0001>
module attributes {stable_mosaic.version = 11 : i64} {
  func.func @rnn_fc_kernel(%arg0: i32, %arg1: memref<8x8x8xf32, #tpu.memory_space<vmem>>, %arg2: memref<8x32xf32, #tpu.memory_space<vmem>>, %arg3: memref<32x32xf32, #tpu.memory_space<vmem>>, %arg4: memref<1x32xf32, #tpu.memory_space<vmem>>, %arg5: memref<64x32xf32, #tpu.memory_space<vmem>>, %arg6: memref<1x32xf32, #tpu.memory_space<vmem>>, %arg7: memref<256x128xf32, #tpu.memory_space<vmem>>, %arg8: memref<1x128xf32, #tpu.memory_space<vmem>>, %arg9: memref<8x128xf32, #tpu.memory_space<vmem>>, %arg10: memref<8x256xf32, #tpu.memory_space<vmem>>) attributes {dimension_semantics = [#tpu.dimension_semantics<parallel>], iteration_bounds = array<i64: 1>, scalar_prefetch = 0 : i64, scratch_operands = 1 : i64, tpu.core_type = #tpu.core_type<tc>, window_params = [{transform_indices = @transform_0, window_bounds = array<i64: 8, 8, 8>}, {pipeline_mode = #tpu.pipeline_mode<synchronous>, transform_indices = @transform_1, window_bounds = array<i64: 8, 32>}, {pipeline_mode = #tpu.pipeline_mode<synchronous>, transform_indices = @transform_2, window_bounds = array<i64: 32, 32>}, {pipeline_mode = #tpu.pipeline_mode<synchronous>, transform_indices = @transform_3, window_bounds = array<i64: 1, 32>}, {pipeline_mode = #tpu.pipeline_mode<synchronous>, transform_indices = @transform_4, window_bounds = array<i64: 64, 32>}, {pipeline_mode = #tpu.pipeline_mode<synchronous>, transform_indices = @transform_5, window_bounds = array<i64: 1, 32>}, {pipeline_mode = #tpu.pipeline_mode<synchronous>, transform_indices = @transform_6, window_bounds = array<i64: 256, 128>}, {pipeline_mode = #tpu.pipeline_mode<synchronous>, transform_indices = @transform_7, window_bounds = array<i64: 1, 128>}, {transform_indices = @transform_8, window_bounds = array<i64: 8, 128>}]} {
    %c0 = arith.constant 0 : index
    %c0_0 = arith.constant 0 : index
    %c0_1 = arith.constant 0 : index
    %0 = vector.load %arg1[%c0, %c0_0, %c0_1] : memref<8x8x8xf32, #tpu.memory_space<vmem>>, vector<8x8x8xf32>
    %1 = vector.shape_cast %0 : vector<8x8x8xf32> to vector<64x8xf32>
    %c0_2 = arith.constant 0 : index
    %c0_3 = arith.constant 0 : index
    %2 = vector.load %arg2[%c0_2, %c0_3] : memref<8x32xf32, #tpu.memory_space<vmem>>, vector<8x32xf32>
    %cst = arith.constant dense<0.000000e+00> : vector<64x32xf32>
    %3 = tpu.matmul %1, %2, %cst {dimension_numbers = #tpu.dot_dimension_numbers<[1], [0], [0], [1], [0, 0, 1, 1], [], []>} : vector<64x8xf32>, vector<8x32xf32>, vector<64x32xf32> -> vector<64x32xf32>
    %c0_4 = arith.constant 0 : index
    %c0_5 = arith.constant 0 : index
    %4 = vector.load %arg4[%c0_4, %c0_5] : memref<1x32xf32, #tpu.memory_space<vmem>>, vector<1x32xf32>
    %5 = vector.broadcast %4 : vector<1x32xf32> to vector<64x32xf32>
    %6 = arith.addf %3, %5 : vector<64x32xf32>
    %7 = vector.shape_cast %6 : vector<64x32xf32> to vector<8x8x32xf32>
    %c0_6 = arith.constant 0 : index
    %c0_7 = arith.constant 0 : index
    %8 = vector.load %arg6[%c0_6, %c0_7] : memref<1x32xf32, #tpu.memory_space<vmem>>, vector<1x32xf32>
    %9 = vector.shape_cast %8 : vector<1x32xf32> to vector<1x32xf32>
    %10 = vector.broadcast %9 : vector<1x32xf32> to vector<8x32xf32>
    %cst_8 = arith.constant 0.000000e+00 : f32
    %11 = vector.broadcast %cst_8 : f32 to vector<8x32xf32>
    %cst_9 = arith.constant 0.000000e+00 : f32
    %12 = vector.broadcast %cst_9 : f32 to vector<8x32xf32>
    %13 = vector.extract_strided_slice %7 {offsets = [0, 0, 0], sizes = [8, 1, 32], strides = [1, 1, 1]} : vector<8x8x32xf32> to vector<8x1x32xf32>
    %14 = vector.shape_cast %13 : vector<8x1x32xf32> to vector<8x32xf32>
    %c0_10 = arith.constant 0 : index
    %c0_11 = arith.constant 0 : index
    %15 = vector.load %arg3[%c0_10, %c0_11] : memref<32x32xf32, #tpu.memory_space<vmem>>, vector<32x32xf32>
    %cst_12 = arith.constant dense<0.000000e+00> : vector<8x32xf32>
    %16 = tpu.matmul %11, %15, %cst_12 {dimension_numbers = #tpu.dot_dimension_numbers<[1], [0], [0], [1], [0, 0, 1, 1], [], []>} : vector<8x32xf32>, vector<32x32xf32>, vector<8x32xf32> -> vector<8x32xf32>
    %17 = arith.addf %14, %16 : vector<8x32xf32>
    %18 = math.tanh %17 : vector<8x32xf32>
    %19 = tpu.concatenate %18, %12 in 1 : vector<8x32xf32>, vector<8x32xf32> -> vector<8x64xf32>
    %c0_13 = arith.constant 0 : index
    %c0_14 = arith.constant 0 : index
    %20 = vector.load %arg5[%c0_13, %c0_14] : memref<64x32xf32, #tpu.memory_space<vmem>>, vector<64x32xf32>
    %cst_15 = arith.constant dense<0.000000e+00> : vector<8x32xf32>
    %21 = tpu.matmul %19, %20, %cst_15 {dimension_numbers = #tpu.dot_dimension_numbers<[1], [0], [0], [1], [0, 0, 1, 1], [], []>} : vector<8x64xf32>, vector<64x32xf32>, vector<8x32xf32> -> vector<8x32xf32>
    %22 = arith.addf %21, %10 : vector<8x32xf32>
    %23 = math.tanh %22 : vector<8x32xf32>
    %c0_16 = arith.constant 0 : index
    %c0_17 = arith.constant 0 : index
    %24 = vector.load %arg10[%c0_16, %c0_17] : memref<8x256xf32, #tpu.memory_space<vmem>>, vector<8x32xf32>
    tpu.vector_store %arg10[%c0_16, %c0_17], %23 {strides = array<i32>} : memref<8x256xf32, #tpu.memory_space<vmem>>, vector<8x32xf32>,
    %25 = vector.extract_strided_slice %7 {offsets = [0, 1, 0], sizes = [8, 1, 32], strides = [1, 1, 1]} : vector<8x8x32xf32> to vector<8x1x32xf32>
    %26 = vector.shape_cast %25 : vector<8x1x32xf32> to vector<8x32xf32>
    %c0_18 = arith.constant 0 : index
    %c0_19 = arith.constant 0 : index
    %27 = vector.load %arg3[%c0_18, %c0_19] : memref<32x32xf32, #tpu.memory_space<vmem>>, vector<32x32xf32>
    %cst_20 = arith.constant dense<0.000000e+00> : vector<8x32xf32>
    %28 = tpu.matmul %18, %27, %cst_20 {dimension_numbers = #tpu.dot_dimension_numbers<[1], [0], [0], [1], [0, 0, 1, 1], [], []>} : vector<8x32xf32>, vector<32x32xf32>, vector<8x32xf32> -> vector<8x32xf32>
    %29 = arith.addf %26, %28 : vector<8x32xf32>
    %30 = math.tanh %29 : vector<8x32xf32>
    %31 = tpu.concatenate %30, %23 in 1 : vector<8x32xf32>, vector<8x32xf32> -> vector<8x64xf32>
    %c0_21 = arith.constant 0 : index
    %c0_22 = arith.constant 0 : index
    %32 = vector.load %arg5[%c0_21, %c0_22] : memref<64x32xf32, #tpu.memory_space<vmem>>, vector<64x32xf32>
    %cst_23 = arith.constant dense<0.000000e+00> : vector<8x32xf32>
    %33 = tpu.matmul %31, %32, %cst_23 {dimension_numbers = #tpu.dot_dimension_numbers<[1], [0], [0], [1], [0, 0, 1, 1], [], []>} : vector<8x64xf32>, vector<64x32xf32>, vector<8x32xf32> -> vector<8x32xf32>
    %34 = arith.addf %33, %10 : vector<8x32xf32>
    %35 = math.tanh %34 : vector<8x32xf32>
    %c0_24 = arith.constant 0 : index
    %c32 = arith.constant 32 : index
    %36 = vector.load %arg10[%c0_24, %c32] : memref<8x256xf32, #tpu.memory_space<vmem>>, vector<8x32xf32>
    tpu.vector_store %arg10[%c0_24, %c32], %35 {strides = array<i32>} : memref<8x256xf32, #tpu.memory_space<vmem>>, vector<8x32xf32>,
    %37 = vector.extract_strided_slice %7 {offsets = [0, 2, 0], sizes = [8, 1, 32], strides = [1, 1, 1]} : vector<8x8x32xf32> to vector<8x1x32xf32>
    %38 = vector.shape_cast %37 : vector<8x1x32xf32> to vector<8x32xf32>
    %c0_25 = arith.constant 0 : index
    %c0_26 = arith.constant 0 : index
    %39 = vector.load %arg3[%c0_25, %c0_26] : memref<32x32xf32, #tpu.memory_space<vmem>>, vector<32x32xf32>
    %cst_27 = arith.constant dense<0.000000e+00> : vector<8x32xf32>
    %40 = tpu.matmul %30, %39, %cst_27 {dimension_numbers = #tpu.dot_dimension_numbers<[1], [0], [0], [1], [0, 0, 1, 1], [], []>} : vector<8x32xf32>, vector<32x32xf32>, vector<8x32xf32> -> vector<8x32xf32>
    %41 = arith.addf %38, %40 : vector<8x32xf32>
    %42 = math.tanh %41 : vector<8x32xf32>
    %43 = tpu.concatenate %42, %35 in 1 : vector<8x32xf32>, vector<8x32xf32> -> vector<8x64xf32>
    %c0_28 = arith.constant 0 : index
    %c0_29 = arith.constant 0 : index
    %44 = vector.load %arg5[%c0_28, %c0_29] : memref<64x32xf32, #tpu.memory_space<vmem>>, vector<64x32xf32>
    %cst_30 = arith.constant dense<0.000000e+00> : vector<8x32xf32>
    %45 = tpu.matmul %43, %44, %cst_30 {dimension_numbers = #tpu.dot_dimension_numbers<[1], [0], [0], [1], [0, 0, 1, 1], [], []>} : vector<8x64xf32>, vector<64x32xf32>, vector<8x32xf32> -> vector<8x32xf32>
    %46 = arith.addf %45, %10 : vector<8x32xf32>
    %47 = math.tanh %46 : vector<8x32xf32>
    %c0_31 = arith.constant 0 : index
    %c64 = arith.constant 64 : index
    %48 = vector.load %arg10[%c0_31, %c64] : memref<8x256xf32, #tpu.memory_space<vmem>>, vector<8x32xf32>
    tpu.vector_store %arg10[%c0_31, %c64], %47 {strides = array<i32>} : memref<8x256xf32, #tpu.memory_space<vmem>>, vector<8x32xf32>,
    %49 = vector.extract_strided_slice %7 {offsets = [0, 3, 0], sizes = [8, 1, 32], strides = [1, 1, 1]} : vector<8x8x32xf32> to vector<8x1x32xf32>
    %50 = vector.shape_cast %49 : vector<8x1x32xf32> to vector<8x32xf32>
    %c0_32 = arith.constant 0 : index
    %c0_33 = arith.constant 0 : index
    %51 = vector.load %arg3[%c0_32, %c0_33] : memref<32x32xf32, #tpu.memory_space<vmem>>, vector<32x32xf32>
    %cst_34 = arith.constant dense<0.000000e+00> : vector<8x32xf32>
    %52 = tpu.matmul %42, %51, %cst_34 {dimension_numbers = #tpu.dot_dimension_numbers<[1], [0], [0], [1], [0, 0, 1, 1], [], []>} : vector<8x32xf32>, vector<32x32xf32>, vector<8x32xf32> -> vector<8x32xf32>
    %53 = arith.addf %50, %52 : vector<8x32xf32>
    %54 = math.tanh %53 : vector<8x32xf32>
    %55 = tpu.concatenate %54, %47 in 1 : vector<8x32xf32>, vector<8x32xf32> -> vector<8x64xf32>
    %c0_35 = arith.constant 0 : index
    %c0_36 = arith.constant 0 : index
    %56 = vector.load %arg5[%c0_35, %c0_36] : memref<64x32xf32, #tpu.memory_space<vmem>>, vector<64x32xf32>
    %cst_37 = arith.constant dense<0.000000e+00> : vector<8x32xf32>
    %57 = tpu.matmul %55, %56, %cst_37 {dimension_numbers = #tpu.dot_dimension_numbers<[1], [0], [0], [1], [0, 0, 1, 1], [], []>} : vector<8x64xf32>, vector<64x32xf32>, vector<8x32xf32> -> vector<8x32xf32>
    %58 = arith.addf %57, %10 : vector<8x32xf32>
    %59 = math.tanh %58 : vector<8x32xf32>
    %c0_38 = arith.constant 0 : index
    %c96 = arith.constant 96 : index
    %60 = vector.load %arg10[%c0_38, %c96] : memref<8x256xf32, #tpu.memory_space<vmem>>, vector<8x32xf32>
    tpu.vector_store %arg10[%c0_38, %c96], %59 {strides = array<i32>} : memref<8x256xf32, #tpu.memory_space<vmem>>, vector<8x32xf32>,
    %61 = vector.extract_strided_slice %7 {offsets = [0, 4, 0], sizes = [8, 1, 32], strides = [1, 1, 1]} : vector<8x8x32xf32> to vector<8x1x32xf32>
    %62 = vector.shape_cast %61 : vector<8x1x32xf32> to vector<8x32xf32>
    %c0_39 = arith.constant 0 : index
    %c0_40 = arith.constant 0 : index
    %63 = vector.load %arg3[%c0_39, %c0_40] : memref<32x32xf32, #tpu.memory_space<vmem>>, vector<32x32xf32>
    %cst_41 = arith.constant dense<0.000000e+00> : vector<8x32xf32>
    %64 = tpu.matmul %54, %63, %cst_41 {dimension_numbers = #tpu.dot_dimension_numbers<[1], [0], [0], [1], [0, 0, 1, 1], [], []>} : vector<8x32xf32>, vector<32x32xf32>, vector<8x32xf32> -> vector<8x32xf32>
    %65 = arith.addf %62, %64 : vector<8x32xf32>
    %66 = math.tanh %65 : vector<8x32xf32>
    %67 = tpu.concatenate %66, %59 in 1 : vector<8x32xf32>, vector<8x32xf32> -> vector<8x64xf32>
    %c0_42 = arith.constant 0 : index
    %c0_43 = arith.constant 0 : index
    %68 = vector.load %arg5[%c0_42, %c0_43] : memref<64x32xf32, #tpu.memory_space<vmem>>, vector<64x32xf32>
    %cst_44 = arith.constant dense<0.000000e+00> : vector<8x32xf32>
    %69 = tpu.matmul %67, %68, %cst_44 {dimension_numbers = #tpu.dot_dimension_numbers<[1], [0], [0], [1], [0, 0, 1, 1], [], []>} : vector<8x64xf32>, vector<64x32xf32>, vector<8x32xf32> -> vector<8x32xf32>
    %70 = arith.addf %69, %10 : vector<8x32xf32>
    %71 = math.tanh %70 : vector<8x32xf32>
    %c0_45 = arith.constant 0 : index
    %c128 = arith.constant 128 : index
    %72 = vector.load %arg10[%c0_45, %c128] : memref<8x256xf32, #tpu.memory_space<vmem>>, vector<8x32xf32>
    tpu.vector_store %arg10[%c0_45, %c128], %71 {strides = array<i32>} : memref<8x256xf32, #tpu.memory_space<vmem>>, vector<8x32xf32>,
    %73 = vector.extract_strided_slice %7 {offsets = [0, 5, 0], sizes = [8, 1, 32], strides = [1, 1, 1]} : vector<8x8x32xf32> to vector<8x1x32xf32>
    %74 = vector.shape_cast %73 : vector<8x1x32xf32> to vector<8x32xf32>
    %c0_46 = arith.constant 0 : index
    %c0_47 = arith.constant 0 : index
    %75 = vector.load %arg3[%c0_46, %c0_47] : memref<32x32xf32, #tpu.memory_space<vmem>>, vector<32x32xf32>
    %cst_48 = arith.constant dense<0.000000e+00> : vector<8x32xf32>
    %76 = tpu.matmul %66, %75, %cst_48 {dimension_numbers = #tpu.dot_dimension_numbers<[1], [0], [0], [1], [0, 0, 1, 1], [], []>} : vector<8x32xf32>, vector<32x32xf32>, vector<8x32xf32> -> vector<8x32xf32>
    %77 = arith.addf %74, %76 : vector<8x32xf32>
    %78 = math.tanh %77 : vector<8x32xf32>
    %79 = tpu.concatenate %78, %71 in 1 : vector<8x32xf32>, vector<8x32xf32> -> vector<8x64xf32>
    %c0_49 = arith.constant 0 : index
    %c0_50 = arith.constant 0 : index
    %80 = vector.load %arg5[%c0_49, %c0_50] : memref<64x32xf32, #tpu.memory_space<vmem>>, vector<64x32xf32>
    %cst_51 = arith.constant dense<0.000000e+00> : vector<8x32xf32>
    %81 = tpu.matmul %79, %80, %cst_51 {dimension_numbers = #tpu.dot_dimension_numbers<[1], [0], [0], [1], [0, 0, 1, 1], [], []>} : vector<8x64xf32>, vector<64x32xf32>, vector<8x32xf32> -> vector<8x32xf32>
    %82 = arith.addf %81, %10 : vector<8x32xf32>
    %83 = math.tanh %82 : vector<8x32xf32>
    %c0_52 = arith.constant 0 : index
    %c160 = arith.constant 160 : index
    %84 = vector.load %arg10[%c0_52, %c160] : memref<8x256xf32, #tpu.memory_space<vmem>>, vector<8x32xf32>
    tpu.vector_store %arg10[%c0_52, %c160], %83 {strides = array<i32>} : memref<8x256xf32, #tpu.memory_space<vmem>>, vector<8x32xf32>,
    %85 = vector.extract_strided_slice %7 {offsets = [0, 6, 0], sizes = [8, 1, 32], strides = [1, 1, 1]} : vector<8x8x32xf32> to vector<8x1x32xf32>
    %86 = vector.shape_cast %85 : vector<8x1x32xf32> to vector<8x32xf32>
    %c0_53 = arith.constant 0 : index
    %c0_54 = arith.constant 0 : index
    %87 = vector.load %arg3[%c0_53, %c0_54] : memref<32x32xf32, #tpu.memory_space<vmem>>, vector<32x32xf32>
    %cst_55 = arith.constant dense<0.000000e+00> : vector<8x32xf32>
    %88 = tpu.matmul %78, %87, %cst_55 {dimension_numbers = #tpu.dot_dimension_numbers<[1], [0], [0], [1], [0, 0, 1, 1], [], []>} : vector<8x32xf32>, vector<32x32xf32>, vector<8x32xf32> -> vector<8x32xf32>
    %89 = arith.addf %86, %88 : vector<8x32xf32>
    %90 = math.tanh %89 : vector<8x32xf32>
    %91 = tpu.concatenate %90, %83 in 1 : vector<8x32xf32>, vector<8x32xf32> -> vector<8x64xf32>
    %c0_56 = arith.constant 0 : index
    %c0_57 = arith.constant 0 : index
    %92 = vector.load %arg5[%c0_56, %c0_57] : memref<64x32xf32, #tpu.memory_space<vmem>>, vector<64x32xf32>
    %cst_58 = arith.constant dense<0.000000e+00> : vector<8x32xf32>
    %93 = tpu.matmul %91, %92, %cst_58 {dimension_numbers = #tpu.dot_dimension_numbers<[1], [0], [0], [1], [0, 0, 1, 1], [], []>} : vector<8x64xf32>, vector<64x32xf32>, vector<8x32xf32> -> vector<8x32xf32>
    %94 = arith.addf %93, %10 : vector<8x32xf32>
    %95 = math.tanh %94 : vector<8x32xf32>
    %c0_59 = arith.constant 0 : index
    %c192 = arith.constant 192 : index
    %96 = vector.load %arg10[%c0_59, %c192] : memref<8x256xf32, #tpu.memory_space<vmem>>, vector<8x32xf32>
    tpu.vector_store %arg10[%c0_59, %c192], %95 {strides = array<i32>} : memref<8x256xf32, #tpu.memory_space<vmem>>, vector<8x32xf32>,
    %97 = vector.extract_strided_slice %7 {offsets = [0, 7, 0], sizes = [8, 1, 32], strides = [1, 1, 1]} : vector<8x8x32xf32> to vector<8x1x32xf32>
    %98 = vector.shape_cast %97 : vector<8x1x32xf32> to vector<8x32xf32>
    %c0_60 = arith.constant 0 : index
    %c0_61 = arith.constant 0 : index
    %99 = vector.load %arg3[%c0_60, %c0_61] : memref<32x32xf32, #tpu.memory_space<vmem>>, vector<32x32xf32>
    %cst_62 = arith.constant dense<0.000000e+00> : vector<8x32xf32>
    %100 = tpu.matmul %90, %99, %cst_62 {dimension_numbers = #tpu.dot_dimension_numbers<[1], [0], [0], [1], [0, 0, 1, 1], [], []>} : vector<8x32xf32>, vector<32x32xf32>, vector<8x32xf32> -> vector<8x32xf32>
    %101 = arith.addf %98, %100 : vector<8x32xf32>
    %102 = math.tanh %101 : vector<8x32xf32>
    %103 = tpu.concatenate %102, %95 in 1 : vector<8x32xf32>, vector<8x32xf32> -> vector<8x64xf32>
    %c0_63 = arith.constant 0 : index
    %c0_64 = arith.constant 0 : index
    %104 = vector.load %arg5[%c0_63, %c0_64] : memref<64x32xf32, #tpu.memory_space<vmem>>, vector<64x32xf32>
    %cst_65 = arith.constant dense<0.000000e+00> : vector<8x32xf32>
    %105 = tpu.matmul %103, %104, %cst_65 {dimension_numbers = #tpu.dot_dimension_numbers<[1], [0], [0], [1], [0, 0, 1, 1], [], []>} : vector<8x64xf32>, vector<64x32xf32>, vector<8x32xf32> -> vector<8x32xf32>
    %106 = arith.addf %105, %10 : vector<8x32xf32>
    %107 = math.tanh %106 : vector<8x32xf32>
    %c0_66 = arith.constant 0 : index
    %c224 = arith.constant 224 : index
    %108 = vector.load %arg10[%c0_66, %c224] : memref<8x256xf32, #tpu.memory_space<vmem>>, vector<8x32xf32>
    tpu.vector_store %arg10[%c0_66, %c224], %107 {strides = array<i32>} : memref<8x256xf32, #tpu.memory_space<vmem>>, vector<8x32xf32>,
    %c0_67 = arith.constant 0 : index
    %c0_68 = arith.constant 0 : index
    %109 = vector.load %arg10[%c0_67, %c0_68] : memref<8x256xf32, #tpu.memory_space<vmem>>, vector<8x256xf32>
    %c0_69 = arith.constant 0 : index
    %c0_70 = arith.constant 0 : index
    %110 = vector.load %arg7[%c0_69, %c0_70] : memref<256x128xf32, #tpu.memory_space<vmem>>, vector<256x128xf32>
    %cst_71 = arith.constant dense<0.000000e+00> : vector<8x128xf32>
    %111 = tpu.matmul %109, %110, %cst_71 {dimension_numbers = #tpu.dot_dimension_numbers<[1], [0], [0], [1], [0, 0, 1, 1], [], []>} : vector<8x256xf32>, vector<256x128xf32>, vector<8x128xf32> -> vector<8x128xf32>
    %c0_72 = arith.constant 0 : index
    %c0_73 = arith.constant 0 : index
    %112 = vector.load %arg8[%c0_72, %c0_73] : memref<1x128xf32, #tpu.memory_space<vmem>>, vector<1x128xf32>
    %113 = vector.broadcast %112 : vector<1x128xf32> to vector<8x128xf32>
    %114 = arith.addf %111, %113 : vector<8x128xf32>
    %c0_74 = arith.constant 0 : index
    %c0_75 = arith.constant 0 : index
    %115 = vector.load %arg9[%c0_74, %c0_75] : memref<8x128xf32, #tpu.memory_space<vmem>>, vector<8x128xf32>
    tpu.vector_store %arg9[%c0_74, %c0_75], %114 {strides = array<i32>} : memref<8x128xf32, #tpu.memory_space<vmem>>, vector<8x128xf32>,
    return
  }
  func.func @transform_0(%arg0: i32) -> (i32, i32, i32) {
    %c0_i32 = arith.constant 0 : i32
    %c0_i32_0 = arith.constant 0 : i32
    %c0_i32_1 = arith.constant 0 : i32
    return %arg0, %c0_i32, %c0_i32_0 : i32, i32, i32
  }
  func.func @transform_1(%arg0: i32) -> (i32, i32) {
    %c0_i32 = arith.constant 0 : i32
    %c0_i32_0 = arith.constant 0 : i32
    %c0_i32_1 = arith.constant 0 : i32
    return %c0_i32, %c0_i32_0 : i32, i32
  }
  func.func @transform_2(%arg0: i32) -> (i32, i32) {
    %c0_i32 = arith.constant 0 : i32
    %c0_i32_0 = arith.constant 0 : i32
    %c0_i32_1 = arith.constant 0 : i32
    return %c0_i32, %c0_i32_0 : i32, i32
  }
  func.func @transform_3(%arg0: i32) -> (i32, i32) {
    %c0_i32 = arith.constant 0 : i32
    %c0_i32_0 = arith.constant 0 : i32
    %c0_i32_1 = arith.constant 0 : i32
    return %c0_i32, %c0_i32_0 : i32, i32
  }
  func.func @transform_4(%arg0: i32) -> (i32, i32) {
    %c0_i32 = arith.constant 0 : i32
    %c0_i32_0 = arith.constant 0 : i32
    %c0_i32_1 = arith.constant 0 : i32
    return %c0_i32, %c0_i32_0 : i32, i32
  }
  func.func @transform_5(%arg0: i32) -> (i32, i32) {
    %c0_i32 = arith.constant 0 : i32
    %c0_i32_0 = arith.constant 0 : i32
    %c0_i32_1 = arith.constant 0 : i32
    return %c0_i32, %c0_i32_0 : i32, i32
  }
  func.func @transform_6(%arg0: i32) -> (i32, i32) {
    %c0_i32 = arith.constant 0 : i32
    %c0_i32_0 = arith.constant 0 : i32
    %c0_i32_1 = arith.constant 0 : i32
    return %c0_i32, %c0_i32_0 : i32, i32
  }
  func.func @transform_7(%arg0: i32) -> (i32, i32) {
    %c0_i32 = arith.constant 0 : i32
    %c0_i32_0 = arith.constant 0 : i32
    %c0_i32_1 = arith.constant 0 : i32
    return %c0_i32, %c0_i32_0 : i32, i32
  }
  func.func @transform_8(%arg0: i32) -> (i32, i32) {
    %c0_i32 = arith.constant 0 : i32
    %c0_i32_0 = arith.constant 0 : i32
    return %arg0, %c0_i32 : i32, i32
  }
}

</mosaic_0001>

<bundles_post_ra>
// kernel: tpu_custom_call.1
= control target key start
LH: loop header
LB: loop body
LE: loop exit
PB: predicated region body
PF: predicated region fallthrough
CT: control target
= control target key end

     0   :  { %13 = vsyncpa [#allocation4], 0  ;;  %s3622_s0 = inlined_call_operand.vmem [shape: f32[8,8,8], index: 0, kind: input, shape index: {}]   ;;  %s3623_s1 = inlined_call_operand.hbm [shape: f32[8,32], index: 1, kind: input, shape index: {}]   ;;  %s3624_s2 = inlined_call_operand.vmem [shape: f32[32,32], index: 2, kind: input, shape index: {}]   ;;  %s3625_s3 = inlined_call_operand.vmem [shape: f32[1,32], index: 3, kind: input, shape index: {}]   ;;  %s3626_s4 = inlined_call_operand.vmem [shape: f32[64,32], index: 4, kind: input, shape index: {}]   ;;  %s3627_s5 = inlined_call_operand.vmem [shape: f32[1,32], index: 5, kind: input, shape index: {}]   ;;  %s3628_s6 = inlined_call_operand.hbm [shape: f32[256,128], index: 6, kind: input, shape index: {}]   ;;  %s3629_s7 = inlined_call_operand.vmem [shape: f32[1,128], index: 7, kind: input, shape index: {}]   ;;  %s3630_s8 = inlined_call_operand.hbm [shape: f32[8,128], index: 8, kind: output, shape index: {}]  }
   0x1   :  { %14 = vsyncpa [#allocation7], 0 }
   0x2   :  { %15 = vsyncpa [#allocation5], 0  ;;  %s2907_s27 = smov [#allocation3]   ;;  %s2908_s29 = smov [#allocation6]  }
   0x3   :  { %s24_s28 = sshll.u32 %s2907_s27, 4  ;;  %s41_s30 = sshll.u32 %s2908_s29, 4  ;;  %s25_s28 = int_to_ptr.vmem [resolvable:$true] %s24_s28  ;;  %s42_s30 = int_to_ptr.vmem [resolvable:$true] %s41_s30 }
   0x4   :  { %s2849_s9 = scalar_lea.vmem %s25_s28, 128  ;;  %p2854_p1 = scmp.lt.s32.totalorder %s25_s28, %s25_s28 }
   0x5   :  { %p2850_p0 = scmp.ne.s32.totalorder %s25_s28, %s2849_s9  ;;  %p2855_p2 = scmp.lt.s32.totalorder %s2849_s9, %s2849_s9 }
   0x7   :  { %p2856_p3 = por %p2855_p2, %p2854_p1 }
   0x9   :  { %p2857_p4 = pnand %p2856_p3, %p2850_p0 }
   0xb   :  { %2860 = shalt.err (!%p2857_p4)
}
   0xc   :  { %27 = dma.hbm_to_vmem [thread:$0]  %s3623_s1, 128, %s25_s28, [#allocation4]  }
   0xd   :  { %s2869_s12 = scalar_lea.vmem %s42_s30, 4096  ;;  %p2874_p6 = scmp.lt.s32.totalorder %s42_s30, %s42_s30 }
   0xe   :  { %p2870_p5 = scmp.ne.s32.totalorder %s42_s30, %s2869_s12  ;;  %p2875_p7 = scmp.lt.s32.totalorder %s2869_s12, %s2869_s12 }
  0x10   :  { %p2876_p8 = por %p2875_p7, %p2874_p6 }
  0x12   :  { %p2877_p9 = pnand %p2876_p8, %p2870_p5 }
  0x14   :  { %2880 = shalt.err (!%p2877_p9)
}
  0x15   :  { %s2909_s13 = smov 128   ;;  %s2910_s14 = smov 8  }
  0x16   :  { %47 = dma.hbm_to_vmem [thread:$0]  %s3628_s6, 4096, %s42_s30, [#allocation7], %s2909_s13, %s2909_s13, %s2910_s14  }
  0x17   :  { %2901 = dma.done.wait [#allocation4], 128  }
  0x18   :  { %2902 = vsyncadd [#allocation4], 4294967168 }
  0x19   :  { %2903 = dma.done.wait [#allocation7], 4096  }
  0x1a   :  { %2904 = vsyncadd [#allocation7], 4294963200  ;;  %v2911_v0 = vmov 0.0   ;;  %vm2912_vm0 = vmmov 0   ;;  %vm72_vm1 = vcmask 64512   ;;  %v64_v1 = vld [vmem:[#allocation3] sm:$0xff] }
  0x1b   :  { %2446 = vmatprep.subr.mxu1 %v2911_v0  ;;  %2454 = vmatprep.mubr.msk.f32.mxu1 %vm2912_vm0, %v2911_v0  ;;  %v2974_v2 = vld [vmem:[%s3624_s2 + $0x18] sm:$0xff]  ;;  %v56_v3 = vld [vmem:[%s3622_s0] sm:$0xff]  ;;  %v57_v4 = vld [vmem:[%s3622_s0 + $0x8] sm:$0xff]  ;;  %vm328_vm2 = vcmask 1041409   ;;  %vm331_vm3 = vcmask 1042434   ;;  %vm334_vm4 = vcmask 1043459  }
  0x1c   :  { %2432 = vmatprep.subr.mxu0 %v64_v1  ;;  %2447 = vmatpush3.msra.mxu1 %v2974_v2  ;;  %v2986_v5 = vld [vmem:[%s3624_s2 + $0x10] sm:$0xff]  ;;  %v2997_v7 = vld [vmem:[%s3624_s2 + $0x8] sm:$0xff]  ;;  %v59_v8 = vld [vmem:[%s3622_s0 + $0x18] sm:$0xff]  ;;  %vm337_vm5 = vcmask 1044484   ;;  %vm340_vm6 = vcmask 1045509   ;;  %vm343_vm7 = vcmask 1046534  }
  0x1d   :  { %2433 = vmatpush3.msra.mxu0 %v64_v1  ;;  %2434 = vmatprep.mubr.msk.f32.mxu0 %vm72_vm1, %v56_v3  ;;  %v58_v6 = vld [vmem:[%s3622_s0 + $0x10] sm:$0xff]  ;;  %v3008_v9 = vld [vmem:[%s3624_s2] sm:$0xff]  ;;  %v61_v11 = vld [vmem:[%s3622_s0 + $0x28] sm:$0xff]  ;;  %vm346_vm8 = vcmask 1047559   ;;  %vm213_vm9 = vcmask 261120   ;;  %vm358_vm10 = vcmask 523264  }
  0x1e   :  { %2448 = vmatprep.subr.mxu1 %v2911_v0  ;;  %2435 = vmatmul.mubr.msk.f32.vlgmr.msra.gmra.mxu0 %vm72_vm1, %v57_v4  ;;  %v60_v10 = vld [vmem:[%s3622_s0 + $0x20] sm:$0xff]  ;;  %v62_v12 = vld [vmem:[%s3622_s0 + $0x30] sm:$0xff]  ;;  %v63_v13 = vld [vmem:[%s3622_s0 + $0x38] sm:$0xff]  ;;  %s2913_s11 = smov 32   ;;  %vm582_vm11 = vcmask 1046528   ;;  %vm826_vm12 = vcmask 1045504  }
  0x1f   :  { %2449 = vmatpush3.msra.mxu1 %v2986_v5  ;;  %2437 = vmatprep.mubr.msk.f32.mxu0 %vm72_vm1, %v58_v6  ;;  %v3048_v14 = vld [vmem:[%s3626_s4 + $0x38] sm:$0xff]  ;;  %v3053_v15 = vld [vmem:[%s3626_s4 + $0x30] sm:$0xff]  ;;  %v3060_v16 = vld [vmem:[%s3626_s4 + $0x28] sm:$0xff]  ;;  %vm1070_vm13 = vcmask 1044480   ;;  %vm1314_vm14 = vcmask 1043456   ;;  %vm1554_vm15 = vcmask 1042432  }
  0x20   :  { %2450 = vmatprep.subr.mxu1 %v2911_v0  ;;  %2457 = vmatprep.subr.mxu0 %v2911_v0  ;;  %v3067_v17 = vld [vmem:[%s3626_s4 + $0x20] sm:$0xff]  ;;  %v3074_v18 = vld [vmem:[%s3626_s4 + $0x18] sm:$0xff]  ;;  %v3081_v19 = vld [vmem:[%s3626_s4 + $0x10] sm:$0xff]  ;;  %s2915_s10 = smov 96   ;;  %s2916_s13 = smov [#allocation8]  }
  0x21   :  { %2451 = vmatpush3.msra.mxu1 %v2997_v7  ;;  %2458 = vmatpush3.msra.mxu0 %v3048_v14  ;;  %v3088_v20 = vld [vmem:[%s3626_s4 + $0x8] sm:$0xff]  ;;  %v3095_v21 = vld [vmem:[%s3626_s4] sm:$0xff]  ;;  %s2240_s14 = sshll.u32 %s2916_s13, 4  ;;  %s2241_s14 = int_to_ptr.vmem [resolvable:$true] %s2240_s14 }
  0x22   :  { %2452 = vmatprep.subr.mxu1 %v2911_v0  ;;  %2438 = vmatmul.mubr.msk.f32.gmra.mxu0 %vm72_vm1, %v59_v8  ;;  %v2250_v24 = vld [vmem:[%s3625_s3] ss:$0 sm:$0xff]  ;;  %s2881_s15 = scalar_lea.vmem %s2241_s14, 128  ;;  %p2886_p11 = scmp.lt.s32.totalorder %s2241_s14, %s2241_s14 }
  0x23   :  { %2453 = vmatpush3.msra.mxu1 %v3008_v9  ;;  %2440 = vmatprep.mubr.msk.f32.mxu0 %vm72_vm1, %v60_v10  ;;  %p2882_p10 = scmp.ne.s32.totalorder %s2241_s14, %s2881_s15  ;;  %p2887_p12 = scmp.lt.s32.totalorder %s2881_s15, %s2881_s15 }
  0x24   :  { %2455 = vmatmul.mubr.f32.vlgmr.msra.gmra.mxu1 %v2911_v0  ;;  %2476 = vmatprep.subr.mxu1 %v2911_v0 }
  0x25   :  { %2477 = vmatpush3.msra.mxu1 %v2974_v2  ;;  %2484 = vmatprep.mubr.msk.f32.mxu1 %vm2912_vm0, %v2911_v0  ;;  %p2888_p13 = por %p2887_p12, %p2886_p11 }
  0x26   :  { %2441 = vmatmul.mubr.msk.f32.gmra.mxu0 %vm72_vm1, %v61_v11  ;;  %2478 = vmatprep.subr.mxu1 %v2911_v0 }
  0x27   :  { %2443 = vmatprep.mubr.msk.f32.mxu0 %vm72_vm1, %v62_v12  ;;  %2479 = vmatpush3.msra.mxu1 %v2986_v5  ;;  %p2889_p0 = pnand %p2888_p13, %p2882_p10 }
  0x28   :  { %2480 = vmatprep.subr.mxu1 %v2911_v0  ;;  %2459 = vmatprep.subr.mxu0 %v2911_v0 }
  0x29   :  { %2481 = vmatpush3.msra.mxu1 %v2997_v7  ;;  %2460 = vmatpush3.msra.mxu0 %v3053_v15 }
  0x2a   :  { %2444 = vmatmul.mubr.msk.f32.gmra.mxu0 %vm72_vm1, %v63_v13  ;;  %2482 = vmatprep.subr.mxu1 %v2911_v0  ;;  %vm663_vm1 = vcmask 523520  }
  0x2b   :  { %2483 = vmatpush3.msra.mxu1 %v3008_v9  ;;  %2473 = vmatprep.mubr.msk.f32.mxu0 %vm2912_vm0, %v2911_v0 }
  0x2c   :  { %2487 = vmatprep.subr.mxu1 %v2911_v0  ;;  %2461 = vmatprep.subr.mxu0 %v2911_v0 }
  0x2d   :  { %2462 = vmatpush3.msra.mxu0 %v3060_v16 }
  0x2e   :  { %2463 = vmatprep.subr.mxu0 %v2911_v0 }
  0x2f   :  { %2464 = vmatpush3.msra.mxu0 %v3067_v17 }
  0x30   :  { %2465 = vmatprep.subr.mxu0 %v2911_v0 }
  0x31   :  { %2466 = vmatpush3.msra.mxu0 %v3074_v18 }
  0x32   :  { %2467 = vmatprep.subr.mxu0 %v2911_v0 }
  0x33   :  { %2468 = vmatpush3.msra.mxu0 %v3081_v19 }
  0x34   :  { %2469 = vmatprep.subr.mxu0 %v2911_v0 }
  0x35   :  { %2470 = vmatpush3.msra.mxu0 %v3088_v20 }
  0x36   :  { %2471 = vmatprep.subr.mxu0 %v2911_v0 }
  0x37   :  { %2472 = vmatpush3.msra.mxu0 %v3095_v21 }
  0x38   :  { %2517 = vmatprep.subr.mxu0 %v2911_v0 }
  0xde   :  { %v2436_v22 = vpop.f32.mrf.mxu0 }
  0xdf   :  { %v3108_v30 = vadd.f32 %v2436_v22, %v2250_v24 }
  0xe0   :  { %v163_v23 = vpop.f32.mrf.mxu0 }
  0xe1   :  { %v3104_v25 = vadd.f32 %v2250_v24, %v163_v23 }
  0xe2   :  { %v2439_v26 = vpop.f32.mrf.mxu0 }
  0xe3   :  { %v3106_v27 = vadd.f32 %v2439_v26, %v2250_v24 }
  0xe4   :  { %v283_v28 = vpop.f32.mrf.mxu1  ;;  %v173_v29 = vpop.f32.mrf.mxu0 }
  0xe5   :  { %v288_v31 = vrot.slane %v283_v28, 1  ;;  %v289_v32 = vrot.slane %v283_v28, 2  ;;  %v290_v33 = vrot.slane %v283_v28, 3  ;;  %v292_v34 = vrot.slane %v283_v28, 5 }
  0xe6   :  { %v303_v35 = vadd.f32 %v283_v28, %v3104_v25  ;;  %v3111_v36 = vadd.f32 %v2250_v24, %v173_v29  ;;  %v2442_v37 = vpop.f32.mrf.mxu0  ;;  %v2456_v38 = vpop.f32.mrf.mxu1  ;;  %v291_v39 = vrot.slane %v283_v28, 4  ;;  %v294_v49 = vrot.slane %v283_v28, 7 }
  0xe7   :  { %v304_v40 = vadd.f32 %v288_v31, %v3108_v30  ;;  %v306_v41 = vadd.f32 %v290_v33, %v3106_v27  ;;  %v3115_v42 = vadd.f32 %v2442_v37, %v2250_v24  ;;  %v293_v53 = vrot.slane %v283_v28, 6 }
  0xe8   :  { %2696 = vtanh.f32 %v303_v35  ;;  %v183_v43 = vpop.f32.mrf.mxu0  ;;  %v305_v44 = vadd.f32 %v289_v32, %v3111_v36  ;;  %v3177_v35 = vld [vmem:[%s3627_s5] ss:$0 sm:$0xff] }
  0xe9   :  { %2698 = vtanh.f32 %v304_v40  ;;  %v3118_v45 = vadd.f32 %v2250_v24, %v183_v43  ;;  %v308_v47 = vadd.f32 %v292_v34, %v3115_v42 }
  0xea   :  { %2700 = vtanh.f32 %v306_v41  ;;  %v2445_v46 = vpop.f32.mrf.mxu0 }
  0xeb   :  { %v3121_v48 = vadd.f32 %v2445_v46, %v2250_v24  ;;  %v307_v50 = vadd.f32 %v291_v39, %v3118_v45  ;;  %2702 = vtanh.f32 %v305_v44 }
  0xec   :  { %v193_v51 = vpop.f32.mrf.mxu0 }
  0xed   :  { %v3124_v52 = vadd.f32 %v2250_v24, %v193_v51  ;;  %v310_v54 = vadd.f32 %v294_v49, %v3121_v48  ;;  %2704 = vtanh.f32 %v307_v50 }
  0xee   :  { %2706 = vtanh.f32 %v308_v47 }
  0xef   :  { %v309_v55 = vadd.f32 %v293_v53, %v3124_v52  ;;  %2708 = vtanh.f32 %v310_v54 }
  0xf1   :  { %2710 = vtanh.f32 %v309_v55 }
  0xf5   :  { %v2697_v56 = vpop.eup %2696 }
  0xf6   :  { %v2699_v57 = vpop.eup %2698 }
  0xf7   :  { %v2701_v58 = vpop.eup %2700  ;;  %v327_v59 = vrot.slane %v2699_v57, 7 }
  0xf8   :  { %v2703_v60 = vpop.eup %2702  ;;  %v333_v1 = vrot.slane %v2701_v58, 5 }
  0xf9   :  { %v329_v61 = vsel %vm328_vm2, %v327_v59, %v2697_v56  ;;  %v330_v62 = vrot.slane %v2703_v60, 6 }
  0xfa   :  { %v2705_v63 = vpop.eup %2704 }
  0xfb   :  { %v2707_v3 = vpop.eup %2706  ;;  %v332_v4 = vsel %vm331_vm3, %v330_v62, %v329_v61  ;;  %v336_v6 = vrot.slane %v2705_v63, 4 }
  0xfc   :  { %v335_v8 = vsel %vm334_vm4, %v333_v1, %v332_v4  ;;  %v2709_v10 = vpop.eup %2708  ;;  %v339_v13 = vrot.slane %v2707_v3, 3 }
  0xfd   :  { %v338_v11 = vsel %vm337_vm5, %v336_v6, %v335_v8  ;;  %v345_v24 = vrot.slane %v2709_v10, 1 }
  0xfe   :  { %v2711_v12 = vpop.eup %2710  ;;  %v341_v23 = vsel %vm340_vm6, %v339_v13, %v338_v11 }
  0xff   :  { %v342_v22 = vrot.slane %v2711_v12, 2 }
 0x101   :  { %v344_v26 = vsel %vm343_vm7, %v342_v22, %v341_v23 }
 0x102   :  { %v347_v28 = vsel %vm346_vm8, %v345_v24, %v344_v26 }
 0x103   :  { %v349_v29 = vsel %vm213_vm9, %v347_v28, 0.0  ;;  %2485 = vmatmul.mubr.msk.f32.vlgmr.msra.gmra.mxu1 %vm213_vm9, %v347_v28 }
 0x104   :  { %2474 = vmatmul.mubr.msk.f32.vlgmr.msra.gmra.mxu0 %vm358_vm10, %v349_v29  ;;  %2488 = vmatpush3.msra.mxu1 %v3048_v14 }
 0x105   :  { %2489 = vmatprep.subr.mxu1 %v2911_v0  ;;  %2503 = vmatprep.mubr.msk.f32.mxu1 %vm2912_vm0, %v2911_v0 }
 0x106   :  { %2490 = vmatpush3.msra.mxu1 %v3053_v15  ;;  %2518 = vmatpush3.msra.mxu0 %v3048_v14 }
 0x107   :  { %2491 = vmatprep.subr.mxu1 %v2911_v0  ;;  %2519 = vmatprep.subr.mxu0 %v2911_v0 }
 0x108   :  { %2492 = vmatpush3.msra.mxu1 %v3060_v16  ;;  %2520 = vmatpush3.msra.mxu0 %v3053_v15 }
 0x109   :  { %2493 = vmatprep.subr.mxu1 %v2911_v0  ;;  %2521 = vmatprep.subr.mxu0 %v2911_v0 }
 0x10a   :  { %2494 = vmatpush3.msra.mxu1 %v3067_v17  ;;  %2522 = vmatpush3.msra.mxu0 %v3060_v16 }
 0x10b   :  { %2495 = vmatprep.subr.mxu1 %v2911_v0  ;;  %2523 = vmatprep.subr.mxu0 %v2911_v0 }
 0x10c   :  { %2496 = vmatpush3.msra.mxu1 %v3074_v18  ;;  %2524 = vmatpush3.msra.mxu0 %v3067_v17 }
 0x10d   :  { %2497 = vmatprep.subr.mxu1 %v2911_v0  ;;  %2525 = vmatprep.subr.mxu0 %v2911_v0 }
 0x10e   :  { %2498 = vmatpush3.msra.mxu1 %v3081_v19  ;;  %2526 = vmatpush3.msra.mxu0 %v3074_v18 }
 0x10f   :  { %2499 = vmatprep.subr.mxu1 %v2911_v0  ;;  %2527 = vmatprep.subr.mxu0 %v2911_v0 }
 0x110   :  { %2500 = vmatpush3.msra.mxu1 %v3088_v20  ;;  %2528 = vmatpush3.msra.mxu0 %v3081_v19 }
 0x111   :  { %2501 = vmatprep.subr.mxu1 %v2911_v0  ;;  %2529 = vmatprep.subr.mxu0 %v2911_v0 }
 0x112   :  { %2502 = vmatpush3.msra.mxu1 %v3095_v21  ;;  %2530 = vmatpush3.msra.mxu0 %v3088_v20 }
 0x113   :  { %2506 = vmatprep.subr.mxu1 %v2911_v0  ;;  %2531 = vmatprep.subr.mxu0 %v2911_v0 }
 0x114   :  { %2532 = vmatpush3.msra.mxu0 %v3095_v21  ;;  %2533 = vmatprep.mubr.msk.f32.mxu0 %vm2912_vm0, %v2911_v0 }
 0x115   :  { %2566 = vmatprep.subr.mxu0 %v2911_v0 }
 0x1c3   :  { %v506_v31 = vpop.f32.mrf.mxu1 }
 0x1c4   :  { %v428_v32 = vpop.f32.mrf.mxu0  ;;  %v512_v40 = vrot.slane %v506_v31, 1  ;;  %v511_v41 = vrot.slane %v506_v31, 7  ;;  %v527_v43 = vadd.f32 %v506_v31, %v3108_v30  ;;  %v513_v44 = vrot.slane %v506_v31, 2 }
 0x1c5   :  { %v2486_v33 = vpop.f32.mrf.mxu1  ;;  %v429_v37 = vadd.f32 %v3177_v35, %v428_v32  ;;  %v514_v50 = vrot.slane %v506_v31, 3  ;;  %v515_v51 = vrot.slane %v506_v31, 4  ;;  %v516_v54 = vrot.slane %v506_v31, 5 }
 0x1c6   :  { %v2475_v34 = vpop.f32.mrf.mxu0  ;;  %v528_v46 = vadd.f32 %v512_v40, %v3111_v36  ;;  %v526_v47 = vadd.f32 %v511_v41, %v3104_v25  ;;  %v529_v49 = vadd.f32 %v513_v44, %v3106_v27  ;;  %v517_v55 = vrot.slane %v506_v31, 6 }
 0x1c7   :  { %2712 = vtanh.f32 %v429_v37  ;;  %v530_v53 = vadd.f32 %v514_v50, %v3118_v45  ;;  %v531_v56 = vadd.f32 %v515_v51, %v3115_v42  ;;  %v532_v58 = vadd.f32 %v516_v54, %v3124_v52 }
 0x1c8   :  { %2714 = vtanh.f32 %v527_v43  ;;  %v533_v59 = vadd.f32 %v517_v55, %v3121_v48 }
 0x1c9   :  { %2716 = vtanh.f32 %v528_v46 }
 0x1ca   :  { %2718 = vtanh.f32 %v526_v47 }
 0x1cb   :  { %2720 = vtanh.f32 %v529_v49 }
 0x1cc   :  { %2722 = vtanh.f32 %v530_v53 }
 0x1cd   :  { %2724 = vtanh.f32 %v531_v56 }
 0x1ce   :  { %2726 = vtanh.f32 %v532_v58 }
 0x1cf   :  { %2728 = vtanh.f32 %v533_v59 }
 0x1d4   :  { %v2713_v38 = vpop.eup %2712 }
 0x1d5   :  { %433 = vst.msk [vmem:[#allocation2] sm:$0xff] %vm213_vm9, %v2713_v38  ;;  %v566_v39 = vrot.slane %v2713_v38, 7  ;;  %v2715_v57 = vpop.eup %2714 }
 0x1d6   :  { %v2717_v60 = vpop.eup %2716  ;;  %v550_v61 = vrot.slane %v2715_v57, 7 }
 0x1d7   :  { %567 = vrot.lane.b32.xlu0 %v566_v39, %s2913_s11  ;;  %v2719_v62 = vpop.eup %2718  ;;  %v552_v1 = vrot.slane %v2717_v60, 6  ;;  %v671_v22 = vrot.slane %v2717_v60, 7 }
 0x1d8   :  { %v2721_v63 = vpop.eup %2720  ;;  %v551_v3 = vsel %vm331_vm3, %v550_v61, %v2719_v62  ;;  %v669_v10 = vrot.slane %v2719_v62, 1 }
 0x1d9   :  { %v554_v4 = vrot.slane %v2721_v63, 5  ;;  %v553_v6 = vsel %vm334_vm4, %v552_v1, %v551_v3  ;;  %v2723_v8 = vpop.eup %2722  ;;  %v673_v34 = vrot.slane %v2721_v63, 6 }
 0x1da   :  { %v2725_v12 = vpop.eup %2724  ;;  %v556_v13 = vrot.slane %v2723_v8, 4  ;;  %v670_v24 = vsel %vm328_vm2, %v2715_v57, %v669_v10  ;;  %v675_v44 = vrot.slane %v2723_v8, 5 }
 0x1db   :  { %v555_v11 = vsel %vm337_vm5, %v554_v4, %v553_v6  ;;  %v2727_v26 = vpop.eup %2726  ;;  %v558_v28 = vrot.slane %v2725_v12, 3  ;;  %v672_v32 = vsel %vm331_vm3, %v671_v22, %v670_v24  ;;  %v677_v51 = vrot.slane %v2725_v12, 4 }
 0x1dc   :  { %v557_v23 = vsel %vm340_vm6, %v556_v13, %v555_v11  ;;  %v2729_v29 = vpop.eup %2728  ;;  %v560_v33 = vrot.slane %v2727_v26, 2  ;;  %v674_v40 = vsel %vm334_vm4, %v673_v34, %v672_v32  ;;  %v679_v54 = vrot.slane %v2727_v26, 3 }
 0x1dd   :  { %v559_v31 = vsel %vm343_vm7, %v558_v28, %v557_v23  ;;  %v562_v37 = vrot.slane %v2729_v29, 1  ;;  %v676_v49 = vsel %vm337_vm5, %v675_v44, %v674_v40  ;;  %v681_v56 = vrot.slane %v2729_v29, 2 }
 0x1de   :  { %v561_v38 = vsel %vm346_vm8, %v560_v33, %v559_v31  ;;  %v678_v53 = vsel %vm340_vm6, %v677_v51, %v676_v49 }
 0x1df   :  { %v680_v55 = vsel %vm343_vm7, %v679_v54, %v678_v53 }
 0x1e0   :  { %v682_v57 = vsel %vm346_vm8, %v681_v56, %v680_v55 }
 0x249   :  { %v568_v39 = vpop.permute.xlu0 %567 }
 0x24a   :  { %v570_v41 = vsel %vm213_vm9, %v561_v38, %v568_v39  ;;  %v571_v43 = vsel %vm213_vm9, %v562_v37, %v568_v39 }
 0x24b   :  { %v583_v46 = vrot.slane %v570_v41, 1  ;;  %v584_v47 = vrot.slane %v571_v43, 1 }
 0x24d   :  { %v585_v50 = vsel %vm582_vm11, %v583_v46, %v584_v47 }
 0x24e   :  { %2504 = vmatmul.mubr.msk.f32.vlgmr.msra.gmra.mxu1 %vm358_vm10, %v585_v50 }
 0x24f   :  { %2507 = vmatpush3.msra.mxu1 %v2974_v2  ;;  %2514 = vmatprep.mubr.msk.f32.mxu1 %vm2912_vm0, %v2911_v0 }
 0x250   :  { %2508 = vmatprep.subr.mxu1 %v2911_v0 }
 0x251   :  { %2509 = vmatpush3.msra.mxu1 %v2986_v5 }
 0x252   :  { %2510 = vmatprep.subr.mxu1 %v2911_v0 }
 0x253   :  { %2511 = vmatpush3.msra.mxu1 %v2997_v7 }
 0x254   :  { %2512 = vmatprep.subr.mxu1 %v2911_v0 }
 0x255   :  { %2513 = vmatpush3.msra.mxu1 %v3008_v9 }
 0x256   :  { %2515 = vmatmul.mubr.msk.f32.vlgmr.msra.gmra.mxu1 %vm213_vm9, %v682_v57  ;;  %2536 = vmatprep.subr.mxu1 %v2911_v0 }
 0x257   :  { %2537 = vmatpush3.msra.mxu1 %v2974_v2  ;;  %2544 = vmatprep.mubr.msk.f32.mxu1 %vm2912_vm0, %v2911_v0 }
 0x258   :  { %2538 = vmatprep.subr.mxu1 %v2911_v0 }
 0x259   :  { %2539 = vmatpush3.msra.mxu1 %v2986_v5 }
 0x25a   :  { %2540 = vmatprep.subr.mxu1 %v2911_v0 }
 0x25b   :  { %2541 = vmatpush3.msra.mxu1 %v2997_v7 }
 0x25c   :  { %2542 = vmatprep.subr.mxu1 %v2911_v0 }
 0x25d   :  { %2543 = vmatpush3.msra.mxu1 %v3008_v9 }
 0x25e   :  { %2547 = vmatprep.subr.mxu1 %v2911_v0 }
 0x30e   :  { %v654_v58 = vpop.f32.mrf.mxu1 }
 0x30f   :  { %v655_v59 = vadd.f32 %v3177_v35, %v654_v58 }
 0x310   :  { %v2505_v60 = vpop.f32.mrf.mxu1 }
 0x311   :  { %2730 = vtanh.f32 %v655_v59 }
 0x316   :  { %v751_v61 = vpop.f32.mrf.mxu1 }
 0x317   :  { %v756_v62 = vrot.slane %v751_v61, 6  ;;  %v757_v63 = vrot.slane %v751_v61, 7  ;;  %v758_v1 = vrot.slane %v751_v61, 1  ;;  %v759_v3 = vrot.slane %v751_v61, 2 }
 0x318   :  { %v760_v4 = vrot.slane %v751_v61, 3  ;;  %v761_v6 = vrot.slane %v751_v61, 4  ;;  %v773_v8 = vadd.f32 %v751_v61, %v3111_v36  ;;  %v2516_v10 = vpop.f32.mrf.mxu1  ;;  %v762_v11 = vrot.slane %v751_v61, 5 }
 0x319   :  { %v771_v12 = vadd.f32 %v756_v62, %v3104_v25  ;;  %v772_v13 = vadd.f32 %v757_v63, %v3108_v30  ;;  %v774_v22 = vadd.f32 %v758_v1, %v3106_v27  ;;  %v775_v23 = vadd.f32 %v759_v3, %v3118_v45 }
 0x31a   :  { %2732 = vtanh.f32 %v773_v8  ;;  %v776_v24 = vadd.f32 %v760_v4, %v3115_v42  ;;  %v777_v26 = vadd.f32 %v761_v6, %v3124_v52  ;;  %v778_v28 = vadd.f32 %v762_v11, %v3121_v48 }
 0x31b   :  { %2734 = vtanh.f32 %v771_v12 }
 0x31c   :  { %2736 = vtanh.f32 %v772_v13 }
 0x31d   :  { %2738 = vtanh.f32 %v774_v22 }
 0x31e   :  { %v3236_v29 = vpop.eup %2730  ;;  %2740 = vtanh.f32 %v775_v23 }
 0x31f   :  { %2742 = vtanh.f32 %v776_v24  ;;  %v810_v31 = vrot.slane %v3236_v29, 6 }
 0x320   :  { %2744 = vtanh.f32 %v777_v26 }
 0x321   :  { %2746 = vtanh.f32 %v778_v28  ;;  %811 = vrot.lane.b32.xlu0 %v810_v31, %s2913_s11 }
 0x327   :  { %v2733_v32 = vpop.eup %2732 }
 0x328   :  { %v2735_v33 = vpop.eup %2734  ;;  %v797_v44 = vrot.slane %v2733_v32, 6 }
 0x329   :  { %v2737_v34 = vpop.eup %2736  ;;  %v913_v37 = vrot.slane %v2735_v33, 2 }
 0x32a   :  { %v2739_v38 = vpop.eup %2738  ;;  %v914_v39 = vrot.slane %v2737_v34, 1  ;;  %v795_v40 = vrot.slane %v2737_v34, 7 }
 0x32b   :  { %v2741_v41 = vpop.eup %2740  ;;  %v917_v43 = vrot.slane %v2739_v38, 7  ;;  %v799_v51 = vrot.slane %v2739_v38, 5 }
 0x32c   :  { %v2743_v46 = vpop.eup %2742  ;;  %v915_v47 = vsel %vm328_vm2, %v914_v39, %v913_v37  ;;  %v919_v49 = vrot.slane %v2741_v41, 6  ;;  %v796_v50 = vsel %vm334_vm4, %v795_v40, %v2735_v33  ;;  %v801_v57 = vrot.slane %v2741_v41, 4 }
 0x32d   :  { %v2745_v53 = vpop.eup %2744  ;;  %v916_v54 = vsel %vm331_vm3, %v2733_v32, %v915_v47  ;;  %v921_v55 = vrot.slane %v2743_v46, 5  ;;  %v798_v56 = vsel %vm337_vm5, %v797_v44, %v796_v50  ;;  %v803_v61 = vrot.slane %v2743_v46, 3 }
 0x32e   :  { %v2747_v58 = vpop.eup %2746  ;;  %v918_v59 = vsel %vm334_vm4, %v917_v43, %v916_v54  ;;  %v800_v60 = vsel %vm340_vm6, %v799_v51, %v798_v56  ;;  %v805_v62 = vrot.slane %v2745_v53, 2  ;;  %v923_v1 = vrot.slane %v2745_v53, 4 }
 0x32f   :  { %v920_v63 = vsel %vm337_vm5, %v919_v49, %v918_v59  ;;  %v802_v3 = vsel %vm343_vm7, %v801_v57, %v800_v60  ;;  %v806_v4 = vrot.slane %v2747_v58, 1  ;;  %v925_v8 = vrot.slane %v2747_v58, 3 }
 0x330   :  { %v922_v6 = vsel %vm340_vm6, %v921_v55, %v920_v63  ;;  %v804_v10 = vsel %vm346_vm8, %v803_v61, %v802_v3 }
 0x331   :  { %v924_v11 = vsel %vm343_vm7, %v923_v1, %v922_v6  ;;  %v807_v12 = vsel %vm328_vm2, %v806_v4, %v805_v62 }
 0x332   :  { %v926_v13 = vsel %vm346_vm8, %v925_v8, %v924_v11 }
 0x333   :  { %2545 = vmatmul.mubr.msk.f32.vlgmr.msra.gmra.mxu1 %vm213_vm9, %v926_v13 }
 0x334   :  { %2548 = vmatpush3.msra.mxu1 %v3048_v14  ;;  %2563 = vmatprep.mubr.msk.f32.mxu1 %vm2912_vm0, %v2911_v0 }
 0x335   :  { %2549 = vmatprep.subr.mxu1 %v2911_v0 }
 0x336   :  { %2550 = vmatpush3.msra.mxu1 %v3053_v15 }
 0x337   :  { %2551 = vmatprep.subr.mxu1 %v2911_v0 }
 0x338   :  { %2552 = vmatpush3.msra.mxu1 %v3060_v16 }
 0x339   :  { %2553 = vmatprep.subr.mxu1 %v2911_v0 }
 0x33a   :  { %2554 = vmatpush3.msra.mxu1 %v3067_v17 }
 0x33b   :  { %2555 = vmatprep.subr.mxu1 %v2911_v0 }
 0x33c   :  { %2556 = vmatpush3.msra.mxu1 %v3074_v18 }
 0x33d   :  { %2557 = vmatprep.subr.mxu1 %v2911_v0 }
 0x33e   :  { %2558 = vmatpush3.msra.mxu1 %v3081_v19 }
 0x33f   :  { %2559 = vmatprep.subr.mxu1 %v2911_v0 }
 0x340   :  { %2560 = vmatpush3.msra.mxu1 %v3088_v20 }
 0x341   :  { %2561 = vmatprep.subr.mxu1 %v2911_v0 }
 0x342   :  { %2562 = vmatpush3.msra.mxu1 %v3095_v21 }
 0x343   :  { %2596 = vmatprep.subr.mxu1 %v2911_v0 }
 0x393   :  { %v812_v22 = vpop.permute.xlu0 %811 }
 0x394   :  { %v814_v23 = vsel %vm213_vm9, %v804_v10, %v812_v22  ;;  %v815_v24 = vsel %vm213_vm9, %v807_v12, %v812_v22 }
 0x395   :  { %v827_v26 = vrot.slane %v814_v23, 2  ;;  %v828_v28 = vrot.slane %v815_v24, 2 }
 0x397   :  { %v829_v31 = vsel %vm826_vm12, %v827_v26, %v828_v28 }
 0x398   :  { %2534 = vmatmul.mubr.msk.f32.vlgmr.msra.gmra.mxu0 %vm358_vm10, %v829_v31 }
 0x399   :  { %2567 = vmatpush3.msra.mxu0 %v2974_v2  ;;  %2574 = vmatprep.mubr.msk.f32.mxu0 %vm2912_vm0, %v2911_v0 }
 0x39a   :  { %2568 = vmatprep.subr.mxu0 %v2911_v0 }
 0x39b   :  { %2569 = vmatpush3.msra.mxu0 %v2986_v5 }
 0x39c   :  { %2570 = vmatprep.subr.mxu0 %v2911_v0 }
 0x39d   :  { %2571 = vmatpush3.msra.mxu0 %v2997_v7 }
 0x39e   :  { %2572 = vmatprep.subr.mxu0 %v2911_v0 }
 0x39f   :  { %2573 = vmatpush3.msra.mxu0 %v3008_v9 }
 0x3a0   :  { %2577 = vmatprep.subr.mxu0 %v2911_v0 }
 0x3f3   :  { %v995_v32 = vpop.f32.mrf.mxu1 }
 0x3f4   :  { %v1000_v33 = vrot.slane %v995_v32, 5  ;;  %v1001_v34 = vrot.slane %v995_v32, 6  ;;  %v1002_v37 = vrot.slane %v995_v32, 7  ;;  %v1003_v38 = vrot.slane %v995_v32, 1 }
 0x3f5   :  { %v1004_v39 = vrot.slane %v995_v32, 2  ;;  %v1005_v40 = vrot.slane %v995_v32, 3  ;;  %v1018_v41 = vadd.f32 %v995_v32, %v3106_v27  ;;  %v2546_v43 = vpop.f32.mrf.mxu1  ;;  %v1006_v44 = vrot.slane %v995_v32, 4 }
 0x3f6   :  { %v1015_v46 = vadd.f32 %v1000_v33, %v3104_v25  ;;  %v1016_v47 = vadd.f32 %v1001_v34, %v3108_v30  ;;  %v1017_v49 = vadd.f32 %v1002_v37, %v3111_v36  ;;  %v1019_v50 = vadd.f32 %v1003_v38, %v3118_v45 }
 0x3f7   :  { %2748 = vtanh.f32 %v1018_v41  ;;  %v1020_v51 = vadd.f32 %v1004_v39, %v3115_v42  ;;  %v1021_v53 = vadd.f32 %v1005_v40, %v3124_v52  ;;  %v1022_v54 = vadd.f32 %v1006_v44, %v3121_v48 }
 0x3f8   :  { %2750 = vtanh.f32 %v1015_v46 }
 0x3f9   :  { %2752 = vtanh.f32 %v1016_v47 }
 0x3fa   :  { %2754 = vtanh.f32 %v1017_v49 }
 0x3fb   :  { %2756 = vtanh.f32 %v1019_v50 }
 0x3fc   :  { %2758 = vtanh.f32 %v1020_v51 }
 0x3fd   :  { %2760 = vtanh.f32 %v1021_v53 }
 0x3fe   :  { %2762 = vtanh.f32 %v1022_v54 }
 0x404   :  { %v2749_v55 = vpop.eup %2748 }
 0x405   :  { %v2751_v56 = vpop.eup %2750  ;;  %v1043_v10 = vrot.slane %v2749_v55, 5 }
 0x406   :  { %v2753_v57 = vpop.eup %2752  ;;  %v1157_v58 = vrot.slane %v2751_v56, 3 }
 0x407   :  { %v2755_v59 = vpop.eup %2754  ;;  %v1158_v60 = vrot.slane %v2753_v57, 2  ;;  %v1039_v61 = vrot.slane %v2753_v57, 7 }
 0x408   :  { %v2757_v62 = vpop.eup %2756  ;;  %v1160_v63 = vrot.slane %v2755_v59, 1  ;;  %v1041_v1 = vrot.slane %v2755_v59, 6 }
 0x409   :  { %v2759_v3 = vpop.eup %2758  ;;  %v1159_v4 = vsel %vm328_vm2, %v1158_v60, %v1157_v58  ;;  %v1163_v6 = vrot.slane %v2757_v62, 7  ;;  %v1040_v8 = vsel %vm337_vm5, %v1039_v61, %v2751_v56  ;;  %v1045_v22 = vrot.slane %v2757_v62, 4 }
 0x40a   :  { %v2761_v11 = vpop.eup %2760  ;;  %v1161_v12 = vsel %vm331_vm3, %v1160_v63, %v1159_v4  ;;  %v1042_v13 = vsel %vm340_vm6, %v1041_v1, %v1040_v8  ;;  %v1047_v23 = vrot.slane %v2759_v3, 3  ;;  %v1165_v28 = vrot.slane %v2759_v3, 6 }
 0x40b   :  { %v2763_v24 = vpop.eup %2762  ;;  %v1162_v26 = vsel %vm334_vm4, %v2749_v55, %v1161_v12  ;;  %v1044_v31 = vsel %vm343_vm7, %v1043_v10, %v1042_v13  ;;  %v1048_v32 = vrot.slane %v2761_v11, 2  ;;  %v1167_v34 = vrot.slane %v2761_v11, 5 }
 0x40c   :  { %v1164_v33 = vsel %vm337_vm5, %v1163_v6, %v1162_v26  ;;  %v1046_v37 = vsel %vm346_vm8, %v1045_v22, %v1044_v31  ;;  %v1050_v38 = vrot.slane %v2763_v24, 1  ;;  %v1169_v40 = vrot.slane %v2763_v24, 4 }
 0x40d   :  { %v1166_v39 = vsel %vm340_vm6, %v1165_v28, %v1164_v33  ;;  %v1049_v41 = vsel %vm328_vm2, %v1048_v32, %v1047_v23 }
 0x40e   :  { %v1168_v43 = vsel %vm343_vm7, %v1167_v34, %v1166_v39  ;;  %v1051_v44 = vsel %vm331_vm3, %v1050_v38, %v1049_v41 }
 0x40f   :  { %v1170_v46 = vsel %vm346_vm8, %v1169_v40, %v1168_v43 }
 0x410   :  { %2575 = vmatmul.mubr.msk.f32.vlgmr.msra.gmra.mxu0 %vm213_vm9, %v1170_v46 }
 0x411   :  { %2578 = vmatpush3.msra.mxu0 %v3048_v14  ;;  %2593 = vmatprep.mubr.msk.f32.mxu0 %vm2912_vm0, %v2911_v0 }
 0x412   :  { %2579 = vmatprep.subr.mxu0 %v2911_v0 }
 0x413   :  { %2580 = vmatpush3.msra.mxu0 %v3053_v15 }
 0x414   :  { %2581 = vmatprep.subr.mxu0 %v2911_v0 }
 0x415   :  { %2582 = vmatpush3.msra.mxu0 %v3060_v16 }
 0x416   :  { %2583 = vmatprep.subr.mxu0 %v2911_v0 }
 0x417   :  { %2584 = vmatpush3.msra.mxu0 %v3067_v17 }
 0x418   :  { %2585 = vmatprep.subr.mxu0 %v2911_v0 }
 0x419   :  { %2586 = vmatpush3.msra.mxu0 %v3074_v18 }
 0x41a   :  { %2587 = vmatprep.subr.mxu0 %v2911_v0 }
 0x41b   :  { %2588 = vmatpush3.msra.mxu0 %v3081_v19 }
 0x41c   :  { %2589 = vmatprep.subr.mxu0 %v2911_v0 }
 0x41d   :  { %2590 = vmatpush3.msra.mxu0 %v3088_v20 }
 0x41e   :  { %2591 = vmatprep.subr.mxu0 %v2911_v0 }
 0x41f   :  { %2592 = vmatpush3.msra.mxu0 %v3095_v21 }
 0x420   :  { %2626 = vmatprep.subr.mxu0 %v2911_v0 }
 0x458   :  { %v898_v14 = vpop.f32.mrf.mxu0 }
 0x459   :  { %v899_v15 = vadd.f32 %v3177_v35, %v898_v14 }
 0x45a   :  { %v2535_v16 = vpop.f32.mrf.mxu0 }
 0x45b   :  { %2764 = vtanh.f32 %v899_v15 }
 0x468   :  { %v3326_v17 = vpop.eup %2764 }
 0x469   :  { %v1054_v18 = vrot.slane %v3326_v17, 5 }
 0x46b   :  { %1055 = vrot.lane.b32.xlu1 %v1054_v18, %s2913_s11 }
 0x4d0   :  { %v1239_v19 = vpop.f32.mrf.mxu0 }
 0x4d1   :  { %v1244_v47 = vrot.slane %v1239_v19, 4  ;;  %v1245_v20 = vrot.slane %v1239_v19, 5  ;;  %v1246_v49 = vrot.slane %v1239_v19, 6  ;;  %v1247_v50 = vrot.slane %v1239_v19, 7 }
 0x4d2   :  { %v1248_v51 = vrot.slane %v1239_v19, 1  ;;  %v1249_v21 = vrot.slane %v1239_v19, 2  ;;  %v1263_v53 = vadd.f32 %v1239_v19, %v3118_v45  ;;  %v2576_v54 = vpop.f32.mrf.mxu0  ;;  %v1250_v55 = vrot.slane %v1239_v19, 3 }
 0x4d3   :  { %v1259_v56 = vadd.f32 %v1244_v47, %v3104_v25  ;;  %v1260_v57 = vadd.f32 %v1245_v20, %v3108_v30  ;;  %v1261_v58 = vadd.f32 %v1246_v49, %v3111_v36  ;;  %v1262_v59 = vadd.f32 %v1247_v50, %v3106_v27 }
 0x4d4   :  { %2766 = vtanh.f32 %v1263_v53  ;;  %v1264_v60 = vadd.f32 %v1248_v51, %v3115_v42  ;;  %v1265_v61 = vadd.f32 %v1249_v21, %v3124_v52  ;;  %v1266_v62 = vadd.f32 %v1250_v55, %v3121_v48 }
 0x4d5   :  { %2768 = vtanh.f32 %v1259_v56 }
 0x4d6   :  { %2770 = vtanh.f32 %v1260_v57 }
 0x4d7   :  { %2772 = vtanh.f32 %v1261_v58 }
 0x4d8   :  { %2774 = vtanh.f32 %v1262_v59 }
 0x4d9   :  { %2776 = vtanh.f32 %v1264_v60 }
 0x4da   :  { %2778 = vtanh.f32 %v1265_v61 }
 0x4db   :  { %2780 = vtanh.f32 %v1266_v62 }
 0x4dd   :  { %v1056_v63 = vpop.permute.xlu1 %1055 }
 0x4de   :  { %v1058_v1 = vsel %vm213_vm9, %v1046_v37, %v1056_v63  ;;  %v1059_v3 = vsel %vm213_vm9, %v1051_v44, %v1056_v63 }
 0x4df   :  { %v1071_v4 = vrot.slane %v1058_v1, 3  ;;  %v1072_v6 = vrot.slane %v1059_v3, 3 }
 0x4e1   :  { %v2767_v8 = vpop.eup %2766  ;;  %v1073_v10 = vsel %vm1070_vm13, %v1071_v4, %v1072_v6 }
 0x4e2   :  { %v2769_v11 = vpop.eup %2768  ;;  %2564 = vmatmul.mubr.msk.f32.vlgmr.msra.gmra.mxu1 %vm358_vm10, %v1073_v10  ;;  %v1289_v41 = vrot.slane %v2767_v8, 4 }
 0x4e3   :  { %v2771_v12 = vpop.eup %2770  ;;  %2597 = vmatpush3.msra.mxu1 %v2974_v2  ;;  %2604 = vmatprep.mubr.msk.f32.mxu1 %vm2912_vm0, %v2911_v0  ;;  %v1396_v13 = vrot.slane %v2769_v11, 4 }
 0x4e4   :  { %v2773_v22 = vpop.eup %2772  ;;  %2598 = vmatprep.subr.mxu1 %v2911_v0  ;;  %v1397_v23 = vrot.slane %v2771_v12, 3  ;;  %v1283_v24 = vrot.slane %v2771_v12, 7 }
 0x4e5   :  { %v2775_v26 = vpop.eup %2774  ;;  %2599 = vmatpush3.msra.mxu1 %v2986_v5  ;;  %v1399_v28 = vrot.slane %v2773_v22, 2  ;;  %v1285_v31 = vrot.slane %v2773_v22, 6 }
 0x4e6   :  { %v2777_v32 = vpop.eup %2776  ;;  %2600 = vmatprep.subr.mxu1 %v2911_v0  ;;  %v1398_v33 = vsel %vm328_vm2, %v1397_v23, %v1396_v13  ;;  %v1401_v2 = vrot.slane %v2775_v26, 1  ;;  %v1284_v34 = vsel %vm340_vm6, %v1283_v24, %v2769_v11  ;;  %v1287_v37 = vrot.slane %v2775_v26, 5 }
 0x4e7   :  { %v2779_v38 = vpop.eup %2778  ;;  %2601 = vmatpush3.msra.mxu1 %v2997_v7  ;;  %v1400_v39 = vsel %vm331_vm3, %v1399_v28, %v1398_v33  ;;  %v1286_v40 = vsel %vm343_vm7, %v1285_v31, %v1284_v34  ;;  %v1290_v5 = vrot.slane %v2777_v32, 3  ;;  %v1404_v46 = vrot.slane %v2777_v32, 7 }
 0x4e8   :  { %v2781_v43 = vpop.eup %2780  ;;  %2602 = vmatprep.subr.mxu1 %v2911_v0  ;;  %v1402_v44 = vsel %vm334_vm4, %v1401_v2, %v1400_v39  ;;  %v3355_v14 = vsel %vm346_vm8, %v1287_v37, %v1286_v40  ;;  %v1292_v15 = vrot.slane %v2779_v38, 2  ;;  %v1406_v16 = vrot.slane %v2779_v38, 6 }
 0x4e9   :  { %2603 = vmatpush3.msra.mxu1 %v3008_v9  ;;  %v1403_v7 = vsel %vm337_vm5, %v2767_v8, %v1402_v44  ;;  %v1291_v18 = vsel %vm328_vm2, %v1290_v5, %v1289_v41  ;;  %v1294_v19 = vrot.slane %v2781_v43, 1  ;;  %v1408_v20 = vrot.slane %v2781_v43, 5 }
 0x4ea   :  { %v1405_v47 = vsel %vm340_vm6, %v1404_v46, %v1403_v7  ;;  %v1293_v49 = vsel %vm331_vm3, %v1292_v15, %v1291_v18  ;;  %2607 = vmatprep.subr.mxu1 %v2911_v0 }
 0x4eb   :  { %v1407_v50 = vsel %vm343_vm7, %v1406_v16, %v1405_v47  ;;  %v3365_v51 = vsel %vm334_vm4, %v1294_v19, %v1293_v49 }
 0x4ec   :  { %v1409_v9 = vsel %vm346_vm8, %v1408_v20, %v1407_v50 }
 0x4ed   :  { %2605 = vmatmul.mubr.msk.f32.vlgmr.msra.gmra.mxu1 %vm213_vm9, %v1409_v9 }
 0x4ee   :  { %2623 = vmatprep.mubr.msk.f32.mxu1 %vm2912_vm0, %v2911_v0 }
 0x5a2   :  { %v1142_v21 = vpop.f32.mrf.mxu1 }
 0x5a3   :  { %v1143_v53 = vadd.f32 %v3177_v35, %v1142_v21 }
 0x5a4   :  { %v2565_v54 = vpop.f32.mrf.mxu1 }
 0x5a5   :  { %2782 = vtanh.f32 %v1143_v53 }
 0x5ad   :  { %v1478_v55 = vpop.f32.mrf.mxu1 }
 0x5ae   :  { %v1483_v56 = vrot.slane %v1478_v55, 3  ;;  %v1484_v57 = vrot.slane %v1478_v55, 4  ;;  %v1485_v58 = vrot.slane %v1478_v55, 5  ;;  %v1486_v59 = vrot.slane %v1478_v55, 6 }
 0x5af   :  { %v1487_v60 = vrot.slane %v1478_v55, 7  ;;  %v1488_v61 = vrot.slane %v1478_v55, 1  ;;  %v1503_v62 = vadd.f32 %v1478_v55, %v3115_v42  ;;  %v2606_v63 = vpop.f32.mrf.mxu1  ;;  %v1489_v1 = vrot.slane %v1478_v55, 2 }
 0x5b0   :  { %v1498_v3 = vadd.f32 %v1483_v56, %v3104_v25  ;;  %v1499_v4 = vadd.f32 %v1484_v57, %v3108_v30  ;;  %v1500_v6 = vadd.f32 %v1485_v58, %v3111_v36  ;;  %v1501_v8 = vadd.f32 %v1486_v59, %v3106_v27  ;;  %v3404_v58 = vld [vmem:[%s3624_s2 + $0x18] sm:$0xff]  ;;  %v3428_v63 = vld [vmem:[%s3624_s2] sm:$0xff] }
 0x5b1   :  { %2784 = vtanh.f32 %v1503_v62  ;;  %v1502_v11 = vadd.f32 %v1487_v60, %v3118_v45  ;;  %v1504_v12 = vadd.f32 %v1488_v61, %v3124_v52  ;;  %v1505_v22 = vadd.f32 %v1489_v1, %v3121_v48  ;;  %v3421_v61 = vld [vmem:[%s3624_s2 + $0x8] sm:$0xff] }
 0x5b2   :  { %v3377_v10 = vpop.eup %2782  ;;  %2786 = vtanh.f32 %v1498_v3 }
 0x5b3   :  { %2788 = vtanh.f32 %v1499_v4  ;;  %v1298_v13 = vrot.slane %v3377_v10, 4 }
 0x5b4   :  { %2790 = vtanh.f32 %v1500_v6  ;;  %v3442_v6 = vld [vmem:[%s3626_s4 + $0x38] sm:$0xff] }
 0x5b5   :  { %2792 = vtanh.f32 %v1501_v8  ;;  %1299 = vrot.lane.b32.xlu1 %v1298_v13, %s2913_s11  ;;  %v3447_v8 = vld [vmem:[%s3626_s4 + $0x30] sm:$0xff]  ;;  %2608 = vmatpush3.msra.mxu1 %v3442_v6  ;;  %v3473_v13 = vld [vmem:[%s3626_s4 + $0x18] sm:$0xff] }
 0x5b6   :  { %2794 = vtanh.f32 %v1502_v11  ;;  %2609 = vmatprep.subr.mxu1 %v2911_v0  ;;  %v3455_v11 = vld [vmem:[%s3626_s4 + $0x28] sm:$0xff] }
 0x5b7   :  { %2796 = vtanh.f32 %v1504_v12  ;;  %2610 = vmatpush3.msra.mxu1 %v3447_v8  ;;  %v3464_v12 = vld [vmem:[%s3626_s4 + $0x20] sm:$0xff] }
 0x5b8   :  { %2798 = vtanh.f32 %v1505_v22  ;;  %2611 = vmatprep.subr.mxu1 %v2911_v0  ;;  %v3482_v22 = vld [vmem:[%s3626_s4 + $0x10] sm:$0xff] }
 0x5b9   :  { %2612 = vmatpush3.msra.mxu1 %v3455_v11 }
 0x5ba   :  { %2613 = vmatprep.subr.mxu1 %v2911_v0 }
 0x5bb   :  { %2614 = vmatpush3.msra.mxu1 %v3464_v12 }
 0x5bc   :  { %2615 = vmatprep.subr.mxu1 %v2911_v0 }
 0x5bd   :  { %2616 = vmatpush3.msra.mxu1 %v3473_v13 }
 0x5be   :  { %v2785_v23 = vpop.eup %2784  ;;  %2617 = vmatprep.subr.mxu1 %v2911_v0 }
 0x5bf   :  { %v2787_v24 = vpop.eup %2786  ;;  %v1529_v5 = vrot.slane %v2785_v23, 3  ;;  %2618 = vmatpush3.msra.mxu1 %v3482_v22 }
 0x5c0   :  { %v2789_v26 = vpop.eup %2788  ;;  %v1640_v18 = vrot.slane %v2787_v24, 5  ;;  %2619 = vmatprep.subr.mxu1 %v2911_v0 }
 0x5c1   :  { %v2791_v28 = vpop.eup %2790  ;;  %v1522_v31 = vrot.slane %v2789_v26, 7  ;;  %v1641_v19 = vrot.slane %v2789_v26, 4 }
 0x5c2   :  { %v2793_v32 = vpop.eup %2792  ;;  %v1524_v33 = vrot.slane %v2791_v28, 6  ;;  %v1643_v47 = vrot.slane %v2791_v28, 3  ;;  %v3497_v28 = vld [vmem:[%s3626_s4 + $0x8] sm:$0xff] }
 0x5c3   :  { %v2795_v2 = vpop.eup %2794  ;;  %v1523_v34 = vsel %vm343_vm7, %v1522_v31, %v2787_v24  ;;  %v1526_v37 = vrot.slane %v2793_v32, 5  ;;  %v1642_v20 = vsel %vm328_vm2, %v1641_v19, %v1640_v18  ;;  %v1645_v50 = vrot.slane %v2793_v32, 2  ;;  %v3502_v31 = vld [vmem:[%s3626_s4] sm:$0xff]  ;;  %2620 = vmatpush3.msra.mxu1 %v3497_v28 }
 0x5c4   :  { %v2797_v38 = vpop.eup %2796  ;;  %v3386_v39 = vsel %vm346_vm8, %v1524_v33, %v1523_v34  ;;  %v1527_v40 = vrot.slane %v2795_v2, 4  ;;  %v1644_v49 = vsel %vm331_vm3, %v1643_v47, %v1642_v20  ;;  %v1647_v55 = vrot.slane %v2795_v2, 1  ;;  %2621 = vmatprep.subr.mxu1 %v2911_v0 }
 0x5c5   :  { %v2799_v41 = vpop.eup %2798  ;;  %v1531_v44 = vrot.slane %v2797_v38, 2  ;;  %v1646_v21 = vsel %vm334_vm4, %v1645_v50, %v1644_v49  ;;  %v1650_v62 = vrot.slane %v2797_v38, 7  ;;  %2622 = vmatpush3.msra.mxu1 %v3502_v31 }
 0x5c6   :  { %v1528_v43 = vsel %vm328_vm2, %v1527_v40, %v1526_v37  ;;  %v1533_v15 = vrot.slane %v2799_v41, 1  ;;  %v1648_v59 = vsel %vm337_vm5, %v1647_v55, %v1646_v21  ;;  %v1652_v3 = vrot.slane %v2799_v41, 6  ;;  %2656 = vmatprep.subr.mxu1 %v2911_v0 }
 0x5c7   :  { %v1530_v46 = vsel %vm331_vm3, %v1529_v5, %v1528_v43 }
 0x5c8   :  { %v1532_v7 = vsel %vm334_vm4, %v1531_v44, %v1530_v46 }
 0x5c9   :  { %v3392_v16 = vsel %vm337_vm5, %v1533_v15, %v1532_v7 }
 0x627   :  { %v1300_v9 = vpop.permute.xlu1 %1299 }
 0x628   :  { %v1302_v53 = vsel %vm213_vm9, %v3355_v14, %v1300_v9  ;;  %v1303_v54 = vsel %vm213_vm9, %v3365_v51, %v1300_v9  ;;  %v3411_v14 = vld [vmem:[%s3624_s2 + $0x10] sm:$0xff]  ;;  %v1649_v51 = vsel %vm340_vm6, %v2785_v23, %v1648_v59 }
 0x629   :  { %v1315_v56 = vrot.slane %v1302_v53, 4  ;;  %v1316_v57 = vrot.slane %v1303_v54, 4  ;;  %v1651_v1 = vsel %vm343_vm7, %v1650_v62, %v1649_v51 }
 0x62a   :  { %v1653_v4 = vsel %vm346_vm8, %v1652_v3, %v1651_v1 }
 0x62b   :  { %v1317_v60 = vsel %vm1314_vm14, %v1315_v56, %v1316_v57 }
 0x62c   :  { %2594 = vmatmul.mubr.msk.f32.vlgmr.msra.gmra.mxu0 %vm358_vm10, %v1317_v60 }
 0x62d   :  { %2627 = vmatpush3.msra.mxu0 %v3404_v58  ;;  %2634 = vmatprep.mubr.msk.f32.mxu0 %vm2912_vm0, %v2911_v0 }
 0x62e   :  { %2628 = vmatprep.subr.mxu0 %v2911_v0 }
 0x62f   :  { %2629 = vmatpush3.msra.mxu0 %v3411_v14 }
 0x630   :  { %2630 = vmatprep.subr.mxu0 %v2911_v0 }
 0x631   :  { %2631 = vmatpush3.msra.mxu0 %v3421_v61 }
 0x632   :  { %2632 = vmatprep.subr.mxu0 %v2911_v0 }
 0x633   :  { %2633 = vmatpush3.msra.mxu0 %v3428_v63 }
 0x634   :  { %2635 = vmatmul.mubr.msk.f32.vlgmr.msra.gmra.mxu0 %vm213_vm9, %v1653_v4  ;;  %2637 = vmatprep.subr.mxu0 %v2911_v0 }
 0x635   :  { %2653 = vmatprep.mubr.msk.f32.mxu0 %vm2912_vm0, %v2911_v0  ;;  %2638 = vmatpush3.msra.mxu0 %v3442_v6 }
 0x636   :  { %2639 = vmatprep.subr.mxu0 %v2911_v0 }
 0x637   :  { %2640 = vmatpush3.msra.mxu0 %v3447_v8 }
 0x638   :  { %2641 = vmatprep.subr.mxu0 %v2911_v0 }
 0x639   :  { %2642 = vmatpush3.msra.mxu0 %v3455_v11 }
 0x63a   :  { %2643 = vmatprep.subr.mxu0 %v2911_v0 }
 0x63b   :  { %2644 = vmatpush3.msra.mxu0 %v3464_v12 }
 0x63c   :  { %2645 = vmatprep.subr.mxu0 %v2911_v0 }
 0x63d   :  { %2646 = vmatpush3.msra.mxu0 %v3473_v13 }
 0x63e   :  { %2647 = vmatprep.subr.mxu0 %v2911_v0 }
 0x63f   :  { %2648 = vmatpush3.msra.mxu0 %v3482_v22 }
 0x640   :  { %2649 = vmatprep.subr.mxu0 %v2911_v0 }
 0x641   :  { %2650 = vmatpush3.msra.mxu0 %v3497_v28 }
 0x642   :  { %2651 = vmatprep.subr.mxu0 %v2911_v0 }
 0x643   :  { %2652 = vmatpush3.msra.mxu0 %v3502_v31 }
 0x6ec   :  { %v1386_v23 = vpop.f32.mrf.mxu0 }
 0x6ed   :  { %v1387_v24 = vadd.f32 %v3177_v35, %v1386_v23 }
 0x6ee   :  { %v2595_v26 = vpop.f32.mrf.mxu0 }
 0x6ef   :  { %2800 = vtanh.f32 %v1387_v24 }
 0x6f4   :  { %v1722_v32 = vpop.f32.mrf.mxu0 }
 0x6f5   :  { %v1727_v33 = vrot.slane %v1722_v32, 2  ;;  %v1728_v2 = vrot.slane %v1722_v32, 3  ;;  %v1729_v35 = vrot.slane %v1722_v32, 4  ;;  %v1730_v34 = vrot.slane %v1722_v32, 5 }
 0x6f6   :  { %v1731_v37 = vrot.slane %v1722_v32, 6  ;;  %v1732_v38 = vrot.slane %v1722_v32, 7  ;;  %v1748_v40 = vadd.f32 %v1722_v32, %v3124_v52  ;;  %v2636_v41 = vpop.f32.mrf.mxu0  ;;  %v1733_v5 = vrot.slane %v1722_v32, 1 }
 0x6f7   :  { %v1742_v43 = vadd.f32 %v1727_v33, %v3104_v25  ;;  %v1743_v44 = vadd.f32 %v1728_v2, %v3108_v30  ;;  %v1744_v46 = vadd.f32 %v1729_v35, %v3111_v36  ;;  %v1745_v15 = vadd.f32 %v1730_v34, %v3106_v27 }
 0x6f8   :  { %2802 = vtanh.f32 %v1748_v40  ;;  %v1746_v7 = vadd.f32 %v1731_v37, %v3118_v45  ;;  %v1747_v18 = vadd.f32 %v1732_v38, %v3115_v42  ;;  %v1749_v19 = vadd.f32 %v1733_v5, %v3121_v48 }
 0x6f9   :  { %2804 = vtanh.f32 %v1742_v43 }
 0x6fa   :  { %2806 = vtanh.f32 %v1743_v44 }
 0x6fb   :  { %2808 = vtanh.f32 %v1744_v46 }
 0x6fc   :  { %v2801_v47 = vpop.eup %2800  ;;  %2810 = vtanh.f32 %v1745_v15 }
 0x6fd   :  { %1391 = vst.msk [vmem:[#allocation2 + $0x8] sm:$0xff] %vm213_vm9, %v2801_v47  ;;  %2812 = vtanh.f32 %v1746_v7  ;;  %v1538_v20 = vrot.slane %v2801_v47, 3 }
 0x6fe   :  { %2814 = vtanh.f32 %v1747_v18 }
 0x6ff   :  { %2816 = vtanh.f32 %v1749_v19  ;;  %1539 = vrot.lane.b32.xlu0 %v1538_v20, %s2913_s11 }
 0x705   :  { %v2803_v49 = vpop.eup %2802 }
 0x706   :  { %v2805_v50 = vpop.eup %2804  ;;  %v1775_v23 = vrot.slane %v2803_v49, 2 }
 0x707   :  { %v2807_v9 = vpop.eup %2806  ;;  %v1883_v2 = vrot.slane %v2805_v50, 6 }
 0x708   :  { %v2809_v21 = vpop.eup %2808  ;;  %v1766_v53 = vrot.slane %v2807_v9, 7  ;;  %v1884_v35 = vrot.slane %v2807_v9, 5 }
 0x709   :  { %v2811_v54 = vpop.eup %2810  ;;  %v1768_v55 = vrot.slane %v2809_v21, 6  ;;  %v1886_v34 = vrot.slane %v2809_v21, 4 }
 0x70a   :  { %v2813_v56 = vpop.eup %2812  ;;  %v3522_v57 = vsel %vm346_vm8, %v1766_v53, %v2805_v50  ;;  %v1769_v59 = vrot.slane %v2811_v54, 5  ;;  %v1885_v37 = vsel %vm328_vm2, %v1884_v35, %v1883_v2  ;;  %v1888_v40 = vrot.slane %v2811_v54, 3 }
 0x70b   :  { %v2815_v60 = vpop.eup %2814  ;;  %v1771_v51 = vrot.slane %v2813_v56, 4  ;;  %v1887_v38 = vsel %vm331_vm3, %v1886_v34, %v1885_v37  ;;  %v1890_v46 = vrot.slane %v2813_v56, 2 }
 0x70c   :  { %v2817_v62 = vpop.eup %2816  ;;  %v1770_v1 = vsel %vm328_vm2, %v1769_v59, %v1768_v55  ;;  %v1773_v3 = vrot.slane %v2815_v60, 3  ;;  %v1889_v5 = vsel %vm334_vm4, %v1888_v40, %v1887_v38  ;;  %v1892_v47 = vrot.slane %v2815_v60, 1 }
 0x70d   :  { %v1772_v4 = vsel %vm331_vm3, %v1771_v51, %v1770_v1  ;;  %v1777_v26 = vrot.slane %v2817_v62, 1  ;;  %v1891_v18 = vsel %vm337_vm5, %v1890_v46, %v1889_v5  ;;  %v1895_v20 = vrot.slane %v2817_v62, 7 }
 0x70e   :  { %v1774_v24 = vsel %vm334_vm4, %v1773_v3, %v1772_v4 }
 0x70f   :  { %v1776_v32 = vsel %vm337_vm5, %v1775_v23, %v1774_v24 }
 0x710   :  { %v3529_v33 = vsel %vm340_vm6, %v1777_v26, %v1776_v32 }
 0x771   :  { %v1540_v41 = vpop.permute.xlu0 %1539 }
 0x772   :  { %v1542_v43 = vsel %vm213_vm9, %v3386_v39, %v1540_v41  ;;  %v1543_v44 = vsel %vm213_vm9, %v3392_v16, %v1540_v41  ;;  %v1893_v39 = vsel %vm340_vm6, %v1892_v47, %v1891_v18 }
 0x773   :  { %v1555_v15 = vrot.slane %v1542_v43, 5  ;;  %v1556_v7 = vrot.slane %v1543_v44, 5  ;;  %v1894_v16 = vsel %vm343_vm7, %v2803_v49, %v1893_v39 }
 0x775   :  { %v1557_v19 = vsel %vm1554_vm15, %v1555_v15, %v1556_v7 }
 0x776   :  { %2624 = vmatmul.mubr.msk.f32.vlgmr.msra.gmra.mxu1 %vm358_vm10, %v1557_v19 }
 0x777   :  { %2657 = vmatpush3.msra.mxu1 %v3404_v58  ;;  %2664 = vmatprep.mubr.msk.f32.mxu1 %vm2912_vm0, %v2911_v0  ;;  %v1896_v58 = vsel %vm346_vm8, %v1895_v20, %v1894_v16  ;;  %vm907_vm8 = vcmask 785920  }
 0x778   :  { %2658 = vmatprep.subr.mxu1 %v2911_v0 }
 0x779   :  { %2659 = vmatpush3.msra.mxu1 %v3411_v14 }
 0x77a   :  { %2660 = vmatprep.subr.mxu1 %v2911_v0 }
 0x77b   :  { %2661 = vmatpush3.msra.mxu1 %v3421_v61  ;;  %v3574_v61 = vld [vmem:[%s3627_s5] ss:$0 sm:$0xff]  ;;  %s2914_s5 = smov 64  }
 0x77c   :  { %2662 = vmatprep.subr.mxu1 %v2911_v0 }
 0x77d   :  { %2663 = vmatpush3.msra.mxu1 %v3428_v63 }
 0x77e   :  { %2665 = vmatmul.mubr.msk.f32.vlgmr.msra.gmra.mxu1 %vm213_vm9, %v1896_v58  ;;  %2667 = vmatprep.subr.mxu1 %v2911_v0 }
 0x77f   :  { %2668 = vmatpush3.msra.mxu1 %v3442_v6  ;;  %2683 = vmatprep.mubr.msk.f32.mxu1 %vm2912_vm0, %v2911_v0  ;;  %vm1797_vm0 = vcmask 1041408  }
 0x780   :  { %2669 = vmatprep.subr.mxu1 %v2911_v0 }
 0x781   :  { %2670 = vmatpush3.msra.mxu1 %v3447_v8 }
 0x782   :  { %2671 = vmatprep.subr.mxu1 %v2911_v0 }
 0x783   :  { %2672 = vmatpush3.msra.mxu1 %v3455_v11 }
 0x784   :  { %2673 = vmatprep.subr.mxu1 %v2911_v0 }
 0x785   :  { %2674 = vmatpush3.msra.mxu1 %v3464_v12 }
 0x786   :  { %2675 = vmatprep.subr.mxu1 %v2911_v0 }
 0x787   :  { %2676 = vmatpush3.msra.mxu1 %v3473_v13 }
 0x788   :  { %2677 = vmatprep.subr.mxu1 %v2911_v0 }
 0x789   :  { %2678 = vmatpush3.msra.mxu1 %v3482_v22 }
 0x78a   :  { %2679 = vmatprep.subr.mxu1 %v2911_v0 }
 0x78b   :  { %2680 = vmatpush3.msra.mxu1 %v3497_v28 }
 0x78c   :  { %2681 = vmatprep.subr.mxu1 %v2911_v0 }
 0x78d   :  { %2682 = vmatpush3.msra.mxu1 %v3502_v31 }
 0x836   :  { %v1626_v14 = vpop.f32.mrf.mxu1 }
 0x837   :  { %v1627_v63 = vadd.f32 %v3574_v61, %v1626_v14 }
 0x838   :  { %v2625_v6 = vpop.f32.mrf.mxu1 }
 0x839   :  { %2818 = vtanh.f32 %v1627_v63  ;;  %v2155_v6 = vld [vmem:[#allocation6 + $0xf8] sm:$0xff] }
 0x83a   :  { %2397 = vmatprep.subr.mxu0 %v2155_v6 }
 0x83e   :  { %v1965_v8 = vpop.f32.mrf.mxu1 }
 0x83f   :  { %v1972_v59 = vrot.slane %v1965_v8, 3  ;;  %v1973_v60 = vrot.slane %v1965_v8, 4  ;;  %v1974_v3 = vrot.slane %v1965_v8, 5  ;;  %v1975_v4 = vrot.slane %v1965_v8, 6 }
 0x840   :  { %v2666_v11 = vpop.f32.mrf.mxu1  ;;  %v1970_v26 = vrot.slane %v1965_v8, 1 }
 0x841   :  { %v1987_v62 = vadd.f32 %v1972_v59, %v3111_v36  ;;  %v1988_v1 = vadd.f32 %v1973_v60, %v3106_v27  ;;  %v1990_v23 = vadd.f32 %v1975_v4, %v3115_v42  ;;  %v1992_v36 = vadd.f32 %v1965_v8, %v3121_v48  ;;  %v2154_v11 = vld [vmem:[#allocation6 + $0xf0] sm:$0xff] }
 0x842   :  { %v1985_v2 = vadd.f32 %v1970_v26, %v3104_v25  ;;  %v2146_v59 = vld [vmem:[#allocation6 + $0xb0] sm:$0xff]  ;;  %v2125_v26 = vld [vmem:[#allocation6 + $0x8] sm:$0xff] }
 0x843   :  { %v2130_v60 = vld [vmem:[#allocation6 + $0x30] sm:$0xff] }
 0x846   :  { %v2819_v12 = vpop.eup %2818 }
 0x847   :  { %v1781_v13 = vrot.slane %v2819_v12, 2 }
 0x849   :  { %1782 = vrot.lane.b32.xlu1 %v1781_v13, %s2913_s11  ;;  %v2153_v13 = vld [vmem:[#allocation6 + $0xe8] sm:$0xff] }
 0x84d   :  { %1632 = vrot.lane.b32.xlu1 %v2819_v12, %s2913_s11  ;;  %v2138_v12 = vld [vmem:[#allocation6 + $0x70] sm:$0xff] }
 0x8bb   :  { %v1783_v0 = vpop.permute.xlu1 %1782 }
 0x8bc   :  { %v1785_v22 = vsel %vm213_vm9, %v3522_v57, %v1783_v0  ;;  %v1786_v28 = vsel %vm213_vm9, %v3529_v33, %v1783_v0  ;;  %v1971_v57 = vrot.slane %v1965_v8, 2  ;;  %v2137_v0 = vld [vmem:[#allocation6 + $0x68] sm:$0xff] }
 0x8bd   :  { %v1798_v31 = vrot.slane %v1785_v22, 6  ;;  %v1799_v49 = vrot.slane %v1786_v28, 6  ;;  %v2152_v22 = vld [vmem:[#allocation6 + $0xe0] sm:$0xff] }
 0x8be   :  { %v1986_v51 = vadd.f32 %v1971_v57, %v3108_v30  ;;  %v2136_v28 = vld [vmem:[#allocation6 + $0x60] sm:$0xff]  ;;  %v2131_v57 = vld [vmem:[#allocation6 + $0x38] sm:$0xff] }
 0x8bf   :  { %v1633_v50 = vpop.permute.xlu1 %1632  ;;  %v1800_v9 = vsel %vm1797_vm0, %v1798_v31, %v1799_v49  ;;  %v2151_v31 = vld [vmem:[#allocation6 + $0xd8] sm:$0xff] }
 0x8c0   :  { %1635 = vst.msk [vmem:[#allocation2 + $0x8] sm:$0xff] %vm663_vm1, %v1633_v50  ;;  %2654 = vmatmul.mubr.msk.f32.vlgmr.msra.gmra.mxu0 %vm358_vm10, %v1800_v9  ;;  %v2135_v49 = vld [vmem:[#allocation6 + $0x58] sm:$0xff]  ;;  %v2150_v50 = vld [vmem:[#allocation6 + $0xd0] sm:$0xff] }
 0x8c1   :  { %v2134_v9 = vld [vmem:[#allocation6 + $0x50] sm:$0xff] }
 0x980   :  { %v1869_v21 = vpop.f32.mrf.mxu0 }
 0x981   :  { %v1870_v53 = vadd.f32 %v3574_v61, %v1869_v21  ;;  %v2149_v21 = vld [vmem:[#allocation6 + $0xc8] sm:$0xff] }
 0x982   :  { %v2655_v54 = vpop.f32.mrf.mxu0 }
 0x983   :  { %2820 = vtanh.f32 %v1870_v53  ;;  %v2133_v53 = vld [vmem:[#allocation6 + $0x48] sm:$0xff]  ;;  %v2148_v54 = vld [vmem:[#allocation6 + $0xc0] sm:$0xff] }
 0x984   :  { %2822 = vtanh.f32 %v1986_v51  ;;  %v2145_v51 = vld [vmem:[#allocation6 + $0xa8] sm:$0xff] }
 0x985   :  { %2824 = vtanh.f32 %v1987_v62  ;;  %v2129_v62 = vld [vmem:[#allocation6 + $0x28] sm:$0xff] }
 0x986   :  { %2826 = vtanh.f32 %v1988_v1  ;;  %v2144_v1 = vld [vmem:[#allocation6 + $0xa0] sm:$0xff] }
 0x990   :  { %v2821_v55 = vpop.eup %2820 }
 0x991   :  { %1875 = vrot.lane.b32.xlu1 %v2821_v55, %s2914_s5  ;;  %v2024_v56 = vrot.slane %v2821_v55, 1  ;;  %v2823_v24 = vpop.eup %2822  ;;  %v2132_v55 = vld [vmem:[#allocation6 + $0x40] sm:$0xff] }
 0x992   :  { %v2825_v30 = vpop.eup %2824  ;;  %v2009_v32 = vrot.slane %v2823_v24, 7  ;;  %v2142_v24 = vld [vmem:[#allocation6 + $0x90] sm:$0xff] }
 0x993   :  { %2025 = vrot.lane.b32.xlu0 %v2024_v56, %s2913_s11  ;;  %v2827_v27 = vpop.eup %2826  ;;  %v2010_v33 = vrot.slane %v2825_v30, 6  ;;  %v2147_v56 = vld [vmem:[#allocation6 + $0xb8] sm:$0xff]  ;;  %v2126_v30 = vld [vmem:[#allocation6 + $0x10] sm:$0xff] }
 0x995   :  { %v2011_v35 = vsel %vm328_vm2, %v2010_v33, %v2009_v32  ;;  %vm2040_vm2 = vcmask 1040384   ;;  %v2124_v32 = vld [vmem:[#allocation6] sm:$0xff] }
 0x997   :  { %660 = vrot.lane.b32.xlu0 %v3236_v29, %s2913_s11  ;;  %v1989_v29 = vadd.f32 %v1974_v3, %v3118_v45  ;;  %v2012_v45 = vrot.slane %v2827_v27, 5  ;;  %v2140_v27 = vld [vmem:[#allocation6 + $0x80] sm:$0xff] }
 0x999   :  { %2828 = vtanh.f32 %v1989_v29 }
 0x99a   :  { %2830 = vtanh.f32 %v1990_v23  ;;  %v2143_v23 = vld [vmem:[#allocation6 + $0x98] sm:$0xff] }
 0x99b   :  { %904 = vrot.lane.b32.xlu0 %v3326_v17, %s2914_s5  ;;  %v1976_v17 = vrot.slane %v1965_v8, 7  ;;  %v2139_v8 = vld [vmem:[#allocation6 + $0x78] sm:$0xff] }
 0x99c   :  { %2398 = vmatpush3.msra.mxu0 %v2139_v8 }
 0x99d   :  { %2399 = vmatprep.subr.mxu0 %v2154_v11 }
 0x99e   :  { %2400 = vmatpush3.msra.mxu0 %v2138_v12 }
 0x99f   :  { %1148 = vrot.lane.b32.xlu0 %v3377_v10, %s2915_s10  ;;  %v1991_v10 = vadd.f32 %v1976_v17, %v3124_v52  ;;  %v2013_v52 = vsel %vm331_vm3, %v2012_v45, %v2011_v35  ;;  %vm1151_vm3 = vcmask 1048320   ;;  %2401 = vmatprep.subr.mxu0 %v2153_v13  ;;  %v2128_v17 = vld [vmem:[#allocation6 + $0x20] sm:$0xff] }
 0x9a0   :  { %2402 = vmatpush3.msra.mxu0 %v2137_v0 }
 0x9a1   :  { %2832 = vtanh.f32 %v1991_v10  ;;  %2403 = vmatprep.subr.mxu0 %v2152_v22  ;;  %v2127_v10 = vld [vmem:[#allocation6 + $0x18] sm:$0xff] }
 0x9a2   :  { %2834 = vtanh.f32 %v1992_v36  ;;  %2404 = vmatpush3.msra.mxu0 %v2136_v28  ;;  %v2141_v36 = vld [vmem:[#allocation6 + $0x88] sm:$0xff] }
 0x9a3   :  { %2836 = vtanh.f32 %v1985_v2  ;;  %2405 = vmatprep.subr.mxu0 %v2151_v31 }
 0x9a4   :  { %2406 = vmatpush3.msra.mxu0 %v2135_v49 }
 0x9a5   :  { %2407 = vmatprep.subr.mxu0 %v2150_v50 }
 0x9a6   :  { %v2829_v42 = vpop.eup %2828  ;;  %2408 = vmatpush3.msra.mxu0 %v2134_v9 }
 0x9a7   :  { %v2831_v34 = vpop.eup %2830  ;;  %v2014_v37 = vrot.slane %v2829_v42, 4  ;;  %2409 = vmatprep.subr.mxu0 %v2149_v21  ;;  %v2275_v42 = vld [vmem:[%s3629_s7] ss:$0 sm:$0xff] }
 0x9a8   :  { %v2016_v40 = vrot.slane %v2831_v34, 3  ;;  %2410 = vmatpush3.msra.mxu0 %v2133_v53 }
 0x9a9   :  { %v2015_v38 = vsel %vm334_vm4, %v2014_v37, %v2013_v52  ;;  %2411 = vmatprep.subr.mxu0 %v2148_v54 }
 0x9aa   :  { %v2017_v41 = vsel %vm337_vm5, %v2016_v40, %v2015_v38  ;;  %2412 = vmatpush3.msra.mxu0 %v2132_v55 }
 0x9ab   :  { %2413 = vmatprep.subr.mxu0 %v2147_v56 }
 0x9ac   :  { %2414 = vmatpush3.msra.mxu0 %v2131_v57 }
 0x9ad   :  { %2415 = vmatprep.subr.mxu0 %v2146_v59 }
 0x9ae   :  { %v2833_v48 = vpop.eup %2832  ;;  %2416 = vmatpush3.msra.mxu0 %v2130_v60 }
 0x9af   :  { %v2835_v5 = vpop.eup %2834  ;;  %v2018_v43 = vrot.slane %v2833_v48, 2  ;;  %2417 = vmatprep.subr.mxu0 %v2145_v51 }
 0x9b0   :  { %v2020_v46 = vrot.slane %v2835_v5, 1  ;;  %v2837_v15 = vpop.eup %2836  ;;  %2418 = vmatpush3.msra.mxu0 %v2129_v62 }
 0x9b1   :  { %v2019_v25 = vsel %vm340_vm6, %v2018_v43, %v2017_v41  ;;  %2419 = vmatprep.subr.mxu0 %v2144_v1 }
 0x9b2   :  { %v2021_v7 = vsel %vm343_vm7, %v2020_v46, %v2019_v25  ;;  %2420 = vmatpush3.msra.mxu0 %v2128_v17 }
 0x9b3   :  { %2421 = vmatprep.subr.mxu0 %v2143_v23 }
 0x9b4   :  { %2422 = vmatpush3.msra.mxu0 %v2127_v10 }
 0x9b5   :  { %2423 = vmatprep.subr.mxu0 %v2142_v24 }
 0x9b6   :  { %2424 = vmatpush3.msra.mxu0 %v2126_v30 }
 0x9b7   :  { %2425 = vmatprep.subr.mxu0 %v2141_v36 }
 0x9b8   :  { %2426 = vmatpush3.msra.mxu0 %v2125_v26 }
 0x9b9   :  { %2427 = vmatprep.subr.mxu0 %v2140_v27 }
 0x9ba   :  { %2428 = vmatpush3.msra.mxu0 %v2124_v32 }
 0xa03   :  { %v1876_v44 = vpop.permute.xlu1 %1875 }
 0xa04   :  { %1878 = vst.msk [vmem:[#allocation2 + $0x8] sm:$0xff] %vm907_vm8, %v1876_v44 }
 0xa05   :  { %v2026_v18 = vpop.permute.xlu0 %2025 }
 0xa06   :  { %v2028_v19 = vsel %vm213_vm9, %v2837_v15, %v2026_v18  ;;  %v2029_v47 = vsel %vm213_vm9, %v2021_v7, %v2026_v18 }
 0xa07   :  { %v2041_v39 = vrot.slane %v2028_v19, 7  ;;  %v2042_v16 = vrot.slane %v2029_v47, 7 }
 0xa09   :  { %v661_v20 = vpop.permute.xlu0 %660  ;;  %v2043_v58 = vsel %vm2040_vm2, %v2041_v39, %v2042_v16 }
 0xa0a   :  { %664 = vst.msk [vmem:[#allocation2] sm:$0xff] %vm663_vm1, %v661_v20  ;;  %2684 = vmatmul.mubr.msk.f32.vlgmr.msra.gmra.mxu1 %vm358_vm10, %v2043_v58 }
 0xa0d   :  { %v905_v14 = vpop.permute.xlu0 %904 }
 0xa0e   :  { %908 = vst.msk [vmem:[#allocation2] sm:$0xff] %vm907_vm8, %v905_v14 }
 0xa11   :  { %v1149_v63 = vpop.permute.xlu0 %1148 }
 0xa12   :  { %1152 = vst.msk [vmem:[#allocation2] sm:$0xff] %vm1151_vm3, %v1149_v63 }
 0xa19   :  { %v2122_v45 = vld [vmem:[#allocation2] sm:$0xff] }
 0xaca   :  { %v2112_v3 = vpop.f32.mrf.mxu1 }
 0xacb   :  { %v2113_v4 = vadd.f32 %v3574_v61, %v2112_v3 }
 0xacc   :  { %v2685_v29 = vpop.f32.mrf.mxu1 }
 0xacd   :  { %2838 = vtanh.f32 %v2113_v4 }
 0xada   :  { %v2839_v61 = vpop.eup %2838 }
 0xadb   :  { %2118 = vrot.lane.b32.xlu1 %v2839_v61, %s2915_s10 }
 0xb4d   :  { %v2119_v33 = vpop.permute.xlu1 %2118 }
 0xb4e   :  { %2121 = vst.msk [vmem:[#allocation2 + $0x8] sm:$0xff] %vm1151_vm3, %v2119_v33 }
 0xb55   :  { %v2123_v2 = vld [vmem:[#allocation2 + $0x8] sm:$0xff] }
 0xb56   :  { %2227 = vmatprep.mubr.f32.mxu0 %v2123_v2 }
 0xb57   :  { %2228 = vmatmul.mubr.f32.vlgmr.msra.gmra.mxu0 %v2122_v45 }
 0xc17   :  { %v2429_v35 = vpop.f32.mrf.mxu0 }
 0xc19   :  { %v2430_v52 = vpop.f32.mrf.mxu0 }
 0xc1a   :  { %v2431_v34 = vadd.f32 %v2430_v52, %v2429_v35 }
 0xc1c   :  { %v2230_v37 = vadd.f32 %v2431_v34, %v2275_v42 }
 0xc1e   :  { %2233 = vst [vmem:[#allocation8] sm:$0xff] %v2230_v37 }
 0xc1f   :  { %2892 = shalt.err (!%p2889_p0)
}
 0xc20   :  { %2243 = dma.vmem_to_hbm [thread:$0]  %s2241_s14, 128, %s3630_s8, [#allocation5]  }
 0xc21   :  { %2905 = dma.done.wait [#allocation5], 128  }
 0xc22   :  { %2906 = vsyncadd [#allocation5], 4294967168 }
 0xc23   :  { %2247 = vsyncpa [#allocation4], 1 }
 0xc24   :  { %2248 = vsyncpa [#allocation7], 1 }
 0xc25   :  { %2249 = vsyncpa [#allocation5], 1 }

</bundles_post_ra>
